<compile_context>
chip_gen: v7x
topology: tpu7x:2x2x1
jax: 0.10.0
libtpu: 0.0.40
codegen_flags: <defaults>
</compile_context>

<pallas_src>
import functools
import math

import jax
import jax.numpy as jnp
from jax import lax
from jax.experimental import pallas as pl
from jax.experimental.pallas import tpu as pltpu


MM_DTYPE = jnp.bfloat16      # MXU operand dtype (f32 accumulation everywhere)
ACT_DTYPE = jnp.bfloat16     # inter-layer activation dtype in HBM
LN_EPS = 1e-5                # nn.TransformerEncoderLayer default
MASK_VALUE = -1e30


# ------------------------------ helpers --------------------------------------

def _pick_batch_block(batch, seq, max_rows=256):
    """Largest divisor `bb` of batch with bb*seq <= max_rows and >=2 grid
    steps whenever batch >= 2 (keeps both v7x TensorCores busy)."""
    best = 1
    for cand in range(1, batch + 1):
        if batch % cand:
            continue
        if cand * seq > max_rows and cand > 1:
            continue
        if batch // cand >= 2 or batch == 1:
            best = cand
    return best


def _const_spec(shape):
    """Full-array block with a constant index map (weight stays VMEM-resident)."""
    rank = len(shape)

    def idx_map(i, lens_ref):
        del i, lens_ref
        return (0,) * rank

    return pl.BlockSpec(shape, idx_map)


def _layer_vmem_estimate(bb, t, d_model, dff, feat_in, with_emb):
    weights = (4 * d_model * d_model + 2 * d_model * dff) * 2      # bf16 attn+ffn
    weights += (8 * d_model + 2 * dff) * 4                          # biases / LN (f32)
    if with_emb:
        weights += feat_in * d_model * 2 + (t + 1) * d_model * 4    # emb_w bf16, pe/emb_b f32
    act = 2 * 2 * bb * t * max(d_model, feat_in) * 4                # dbl-buffered in+out blocks
    tmp = bb * t * (dff + 8 * d_model) * 4                          # f32 intermediates
    return weights + act + tmp


def _compiler_params(est_bytes):
    vmem = None
    if est_bytes > 12 * (1 << 20):
        # Raise the scoped-VMEM budget (16 MiB default on v5e) when the resident
        # weights + intermediates need it; stay under v7x's 64 MiB physical VMEM.
        vmem = int(min(2 * est_bytes, 60 * (1 << 20)))
    return pltpu.CompilerParams(dimension_semantics=("parallel",),
                                vmem_limit_bytes=vmem)


# --------------------------- fused layer kernel -------------------------------

def _encoder_layer_kernel(lens_ref, *refs, nhead, d_model, dh, bb, t,
                          with_emb, with_pool):
    if with_emb:
        x_ref, emb_w_ref, emb_b_ref, pe_ref = refs[:4]
        rest = refs[4:]
    else:
        h_ref = refs[0]
        rest = refs[1:]
    (wq_ref, wk_ref, wv_ref, wo_ref, bq_ref, bk_ref, bv_ref, bo_ref,
     ln1_g_ref, ln1_b_ref, w1_ref, b1_ref, w2_ref, b2_ref,
     ln2_g_ref, ln2_b_ref, out_ref) = rest

    m = bb * t
    b0 = pl.program_id(0) * bb

    # ---- (first layer only) input embedding + positional encoding ----------
    if with_emb:
        x = x_ref[...].reshape(m, -1).astype(MM_DTYPE)
        h2 = (jnp.dot(x, emb_w_ref[...], preferred_element_type=jnp.float32)
              + emb_b_ref[...])
        h2 = (h2.reshape(bb, t, d_model) + pe_ref[...]).reshape(m, d_model)
    else:
        h2 = h_ref[...].astype(jnp.float32).reshape(m, d_model)

    h_b = h2.astype(MM_DTYPE)                    # single bf16 cast of the rows

    # ---- per-sample key-validity mask from scalar-prefetched lens ----------
    lens_vec = jnp.concatenate(
        [jnp.broadcast_to(lens_ref[b0 + j], (1, 1, 1)) for j in range(bb)],
        axis=0)                                                   # (bb, 1, 1) i32
    valid = lax.broadcasted_iota(jnp.int32, (bb, 1, t), 2) < lens_vec  # (bb,1,t)

    # ---- multi-head self-attention + output projection ----------------------
    # Heads are leading-indexed weight blocks -> no lane slicing / lane concat.
    # TODO(synk): for long sequences convert to a flash-style online softmax
    # with a KV grid axis; dense (T,T) scores are fine at the small T here.
    scale = 1.0 / math.sqrt(dh)
    attn_proj = jnp.zeros((m, d_model), jnp.float32)
    for hd in range(nhead):
        q = (jnp.dot(h_b, wq_ref[hd], preferred_element_type=jnp.float32)
             + bq_ref[hd]) * scale
        k = jnp.dot(h_b, wk_ref[hd], preferred_element_type=jnp.float32) + bk_ref[hd]
        v = jnp.dot(h_b, wv_ref[hd], preferred_element_type=jnp.float32) + bv_ref[hd]
        q = q.reshape(bb, t, dh).astype(MM_DTYPE)
        k = k.reshape(bb, t, dh).astype(MM_DTYPE)
        v = v.reshape(bb, t, dh).astype(MM_DTYPE)
        s = jnp.einsum('bqd,bkd->bqk', q, k, preferred_element_type=jnp.float32)
        s = jnp.where(valid, s, MASK_VALUE)
        s_max = jnp.max(s, axis=-1, keepdims=True)
        e = jnp.exp(s - s_max)
        p = e / jnp.sum(e, axis=-1, keepdims=True)          # exact f32 softmax
        ctx = jnp.einsum('bqk,bkd->bqd', p.astype(MM_DTYPE), v,
                         preferred_element_type=jnp.float32)
        # concat(heads) @ Wo  ==  sum_h ctx_h @ Wo[h]
        attn_proj = attn_proj + jnp.dot(
            ctx.reshape(m, dh).astype(MM_DTYPE), wo_ref[hd],
            preferred_element_type=jnp.float32)

    # ---- residual + LayerNorm1 ----------------------------------------------
    z = h2 + attn_proj + bo_ref[...]
    mu = jnp.mean(z, axis=-1, keepdims=True)
    zc = z - mu
    var = jnp.mean(zc * zc, axis=-1, keepdims=True)
    h1 = zc * lax.rsqrt(var + LN_EPS) * ln1_g_ref[...] + ln1_b_ref[...]

    # ---- FFN + residual + LayerNorm2 (dff intermediate stays in VMEM) ------
    # TODO(synk): for d_model>=1024 / dff>=4096 add a dff "arbitrary" grid axis
    # (or Buffered(1) weight specs) instead of keeping W1+W2 fully resident.
    f = jnp.maximum(
        jnp.dot(h1.astype(MM_DTYPE), w1_ref[...],
                preferred_element_type=jnp.float32) + b1_ref[...], 0.0)
    y = jnp.dot(f.astype(MM_DTYPE), w2_ref[...],
                preferred_element_type=jnp.float32) + b2_ref[...]
    z2 = h1 + y
    mu2 = jnp.mean(z2, axis=-1, keepdims=True)
    zc2 = z2 - mu2
    var2 = jnp.mean(zc2 * zc2, axis=-1, keepdims=True)
    out = zc2 * lax.rsqrt(var2 + LN_EPS) * ln2_g_ref[...] + ln2_b_ref[...]

    if with_pool:
        # ---- masked mean pool fused into the last layer ----------------------
        out3 = out.reshape(bb, t, d_model)
        row_idx = lax.broadcasted_iota(jnp.int32, (t, d_model), 0)
        pieces = []
        for j in range(bb):
            lj = lens_ref[b0 + j]
            hj = jnp.where(row_idx < lj, out3[j], 0.0)
            pieces.append(jnp.sum(hj, axis=0, keepdims=True)
                          / lj.astype(jnp.float32))
        pooled = pieces[0] if bb == 1 else jnp.concatenate(pieces, axis=0)
        out_ref[...] = pooled.reshape(bb, 1, d_model)
    else:
        out_ref[...] = out.reshape(bb, t, d_model).astype(out_ref.dtype)


# ------------------------------ wrapper ---------------------------------------

def encoder_layer(h_or_x, lens, lp, *, nhead, with_emb, with_pool,
                  emb_w=None, emb_b=None, pe=None):
    bsz, t = h_or_x.shape[0], h_or_x.shape[1]
    feat_in = h_or_x.shape[2]
    d_model = emb_w.shape[1] if with_emb else feat_in
    dh = d_model // nhead
    dff = lp["w1"].shape[1]
    bb = _pick_batch_block(bsz, t)
    grid = (bsz // bb,)

    in_specs, args = [], []
    if with_emb:
        in_specs.append(pl.BlockSpec((bb, t, feat_in), lambda i, _lens: (i, 0, 0)))
        args.append(h_or_x)
        for arr in (emb_w, emb_b, pe):
            in_specs.append(_const_spec(arr.shape))
            args.append(arr)
    else:
        in_specs.append(pl.BlockSpec((bb, t, d_model), lambda i, _lens: (i, 0, 0)))
        args.append(h_or_x)
    for name in ("wq_h", "wk_h", "wv_h", "wo_h", "bq_h", "bk_h", "bv_h", "bo",
                 "ln1_g", "ln1_b", "w1", "b1", "w2", "b2", "ln2_g", "ln2_b"):
        arr = lp[name]
        in_specs.append(_const_spec(arr.shape))
        args.append(arr)

    if with_pool:
        out_specs = pl.BlockSpec((bb, 1, d_model), lambda i, _lens: (i, 0, 0))
        out_shape = jax.ShapeDtypeStruct((bsz, 1, d_model), jnp.float32)
    else:
        out_specs = pl.BlockSpec((bb, t, d_model), lambda i, _lens: (i, 0, 0))
        out_shape = jax.ShapeDtypeStruct((bsz, t, d_model), ACT_DTYPE)

    kernel = functools.partial(
        _encoder_layer_kernel, nhead=nhead, d_model=d_model, dh=dh, bb=bb, t=t,
        with_emb=with_emb, with_pool=with_pool)

    grid_spec = pltpu.PrefetchScalarGridSpec(
        num_scalar_prefetch=1, grid=grid, in_specs=in_specs, out_specs=out_specs)

    est = _layer_vmem_estimate(bb, t, d_model, dff, feat_in, with_emb)
    out = pl.pallas_call(
        kernel,
        grid_spec=grid_spec,
        out_shape=out_shape,
        compiler_params=_compiler_params(est),
    )(lens, *args)

    if with_pool:
        return out.reshape(bsz, d_model)
    return out


# --------------------------- model (forward) ----------------------------------

def transformer_encoder_forward(x, lens, params):
    """Mirrors TransformerEncoder_default.forward for 3-D float input."""
    _, t, _ = x.shape
    nhead = params["nhead"]
    layers = params["layers"]
    num_layers = len(layers)

    h = x
    for li, lp in enumerate(layers):
        first = li == 0
        last = li == num_layers - 1
        h = encoder_layer(
            h, lens, lp, nhead=nhead, with_emb=first, with_pool=last,
            emb_w=params["emb_w"] if first else None,
            emb_b=params["emb_b"] if first else None,
            pe=params["pe"][:t] if first else None)
    # h is the (B, d_model) pooled output after the last (fused) layer.
    return h, lens


# ----------------------------- param init -------------------------------------

def init_params(key, input_size, d_model, nhead, dim_ff, num_layers, max_len):
    scale = 0.05

    def w(k, shape):
        return (jax.random.normal(k, shape) * scale).astype(jnp.float32)

    keys = jax.random.split(key, 1 + num_layers)
    ke = jax.random.split(keys[0], 2)
    params = {
        "nhead": nhead,
        "emb_w": w(ke[0], (input_size, d_model)),
        "emb_b": w(ke[1], (1, d_model)),
    }

    # sinusoidal positional encoding table (same formula as PositionalEncoding)
    position = jnp.arange(max_len, dtype=jnp.float32)[:, None]
    div_term = jnp.exp(
        jnp.arange(0, d_model, 2, dtype=jnp.float32) * (-math.log(10000.0) / d_model)
    )
    pe = jnp.zeros((max_len, d_model), jnp.float32)
    pe = pe.at[:, 0::2].set(jnp.sin(position * div_term))
    pe = pe.at[:, 1::2].set(jnp.cos(position * div_term))
    params["pe"] = pe

    layers = []
    for l in range(num_layers):
        kl = jax.random.split(keys[1 + l], 12)
        layers.append(
            dict(
                wq=w(kl[0], (d_model, d_model)), bq=w(kl[1], (1, d_model)),
                wk=w(kl[2], (d_model, d_model)), bk=w(kl[3], (1, d_model)),
                wv=w(kl[4], (d_model, d_model)), bv=w(kl[5], (1, d_model)),
                wo=w(kl[6], (d_model, d_model)), bo=w(kl[7], (1, d_model)),
                w1=w(kl[8], (d_model, dim_ff)), b1=w(kl[9], (1, dim_ff)),
                w2=w(kl[10], (dim_ff, d_model)), b2=w(kl[11], (1, d_model)),
                ln1_g=jnp.ones((1, d_model), jnp.float32),
                ln1_b=jnp.zeros((1, d_model), jnp.float32),
                ln2_g=jnp.ones((1, d_model), jnp.float32),
                ln2_b=jnp.zeros((1, d_model), jnp.float32),
            )
        )
    params["layers"] = layers
    return params


def prepare_params(params):
    """One-time prep: split attention weights per head along a LEADING axis and
    pre-cast all matmul weights to the MXU dtype (biases / LN / PE stay f32)."""
    nhead = params["nhead"]
    out = {
        "nhead": nhead,
        "emb_w": params["emb_w"].astype(MM_DTYPE),
        "emb_b": params["emb_b"].astype(jnp.float32),
        "pe": params["pe"],
        "layers": [],
    }
    for lp in params["layers"]:
        d = lp["wq"].shape[0]
        dh = d // nhead

        def heads_in(wm):       # (d, d) -> (nhead, d, dh)
            return jnp.transpose(wm.reshape(d, nhead, dh), (1, 0, 2))

        def heads_b(bm):        # (1, d) -> (nhead, 1, dh)
            return bm.reshape(nhead, 1, dh)

        out["layers"].append(dict(
            wq_h=heads_in(lp["wq"]).astype(MM_DTYPE),
            wk_h=heads_in(lp["wk"]).astype(MM_DTYPE),
            wv_h=heads_in(lp["wv"]).astype(MM_DTYPE),
            wo_h=lp["wo"].reshape(nhead, dh, d).astype(MM_DTYPE),
            bq_h=heads_b(lp["bq"]), bk_h=heads_b(lp["bk"]), bv_h=heads_b(lp["bv"]),
            bo=lp["bo"],
            ln1_g=lp["ln1_g"], ln1_b=lp["ln1_b"],
            w1=lp["w1"].astype(MM_DTYPE), b1=lp["b1"],
            w2=lp["w2"].astype(MM_DTYPE), b2=lp["b2"],
            ln2_g=lp["ln2_g"], ln2_b=lp["ln2_b"],
        ))
    return out
    # TODO(synk): optionally quantize Wo/W1/W2 to fp8 with per-channel scales on
    # v7x only (MXU fp8 support); keep bf16 on v5e/v6e.


# -------------------------------- main -----------------------------------------

if __name__ == "__main__":
    # small shapes consistent with the module's forward (3-D float input branch)
    B, T, INPUT_SIZE = 2, 8, 12
    D_MODEL, NHEAD, DIM_FF, NUM_LAYERS = 32, 4, 64, 2

    key = jax.random.PRNGKey(0)
    kx, kp = jax.random.split(key)
    x = jax.random.normal(kx, (B, T, INPUT_SIZE), dtype=jnp.float32)
    lens = jnp.array([8, 5], dtype=jnp.int32)

    params = prepare_params(
        init_params(kp, INPUT_SIZE, D_MODEL, NHEAD, DIM_FF, NUM_LAYERS, max_len=64)
    )

    out, lens_out = transformer_encoder_forward(x, lens, params)
    jax.block_until_ready(out)
    assert out.shape == (B, D_MODEL)
    assert bool(jnp.all(jnp.isfinite(out)))

    # TODO(synk): optional Embedding input path (num_embeddings) and `proj` head
    # are not constructed in the default configuration and are omitted.
    print("KERNEL_OK")
</pallas_src>

<mosaic_0001>
module attributes {stable_mosaic.version = 11 : i64} {
  func.func @_encoder_layer_kernel(%arg0: i32, %arg1: memref<2xi32, #tpu.memory_space<smem>>, %arg2: memref<1x8x12xf32, #tpu.memory_space<vmem>>, %arg3: memref<12x32xbf16, #tpu.memory_space<vmem>>, %arg4: memref<1x32xf32, #tpu.memory_space<vmem>>, %arg5: memref<8x32xf32, #tpu.memory_space<vmem>>, %arg6: memref<4x32x8xbf16, #tpu.memory_space<vmem>>, %arg7: memref<4x32x8xbf16, #tpu.memory_space<vmem>>, %arg8: memref<4x32x8xbf16, #tpu.memory_space<vmem>>, %arg9: memref<4x8x32xbf16, #tpu.memory_space<vmem>>, %arg10: memref<4x1x8xf32, #tpu.memory_space<vmem>>, %arg11: memref<4x1x8xf32, #tpu.memory_space<vmem>>, %arg12: memref<4x1x8xf32, #tpu.memory_space<vmem>>, %arg13: memref<1x32xf32, #tpu.memory_space<vmem>>, %arg14: memref<1x32xf32, #tpu.memory_space<vmem>>, %arg15: memref<1x32xf32, #tpu.memory_space<vmem>>, %arg16: memref<32x64xbf16, #tpu.memory_space<vmem>>, %arg17: memref<1x64xf32, #tpu.memory_space<vmem>>, %arg18: memref<64x32xbf16, #tpu.memory_space<vmem>>, %arg19: memref<1x32xf32, #tpu.memory_space<vmem>>, %arg20: memref<1x32xf32, #tpu.memory_space<vmem>>, %arg21: memref<1x32xf32, #tpu.memory_space<vmem>>, %arg22: memref<1x8x32xbf16, #tpu.memory_space<vmem>>) attributes {dimension_semantics = [#tpu.dimension_semantics<parallel>], iteration_bounds = array<i64: 2>, scalar_prefetch = 1 : i64, scratch_operands = 0 : i64, tpu.core_type = #tpu.core_type<tc>, window_params = [{transform_indices = @transform_0, window_bounds = array<i64: 1, 8, 12>}, {pipeline_mode = #tpu.pipeline_mode<synchronous>, transform_indices = @transform_1, window_bounds = array<i64: 12, 32>}, {pipeline_mode = #tpu.pipeline_mode<synchronous>, transform_indices = @transform_2, window_bounds = array<i64: 1, 32>}, {pipeline_mode = #tpu.pipeline_mode<synchronous>, transform_indices = @transform_3, window_bounds = array<i64: 8, 32>}, {pipeline_mode = #tpu.pipeline_mode<synchronous>, transform_indices = @transform_4, window_bounds = array<i64: 4, 32, 8>}, {pipeline_mode = #tpu.pipeline_mode<synchronous>, transform_indices = @transform_5, window_bounds = array<i64: 4, 32, 8>}, {pipeline_mode = #tpu.pipeline_mode<synchronous>, transform_indices = @transform_6, window_bounds = array<i64: 4, 32, 8>}, {pipeline_mode = #tpu.pipeline_mode<synchronous>, transform_indices = @transform_7, window_bounds = array<i64: 4, 8, 32>}, {pipeline_mode = #tpu.pipeline_mode<synchronous>, transform_indices = @transform_8, window_bounds = array<i64: 4, 1, 8>}, {pipeline_mode = #tpu.pipeline_mode<synchronous>, transform_indices = @transform_9, window_bounds = array<i64: 4, 1, 8>}, {pipeline_mode = #tpu.pipeline_mode<synchronous>, transform_indices = @transform_10, window_bounds = array<i64: 4, 1, 8>}, {pipeline_mode = #tpu.pipeline_mode<synchronous>, transform_indices = @transform_11, window_bounds = array<i64: 1, 32>}, {pipeline_mode = #tpu.pipeline_mode<synchronous>, transform_indices = @transform_12, window_bounds = array<i64: 1, 32>}, {pipeline_mode = #tpu.pipeline_mode<synchronous>, transform_indices = @transform_13, window_bounds = array<i64: 1, 32>}, {pipeline_mode = #tpu.pipeline_mode<synchronous>, transform_indices = @transform_14, window_bounds = array<i64: 32, 64>}, {pipeline_mode = #tpu.pipeline_mode<synchronous>, transform_indices = @transform_15, window_bounds = array<i64: 1, 64>}, {pipeline_mode = #tpu.pipeline_mode<synchronous>, transform_indices = @transform_16, window_bounds = array<i64: 64, 32>}, {pipeline_mode = #tpu.pipeline_mode<synchronous>, transform_indices = @transform_17, window_bounds = array<i64: 1, 32>}, {pipeline_mode = #tpu.pipeline_mode<synchronous>, transform_indices = @transform_18, window_bounds = array<i64: 1, 32>}, {pipeline_mode = #tpu.pipeline_mode<synchronous>, transform_indices = @transform_19, window_bounds = array<i64: 1, 32>}, {transform_indices = @transform_20, window_bounds = array<i64: 1, 8, 32>}]} {
    %c1_i32 = arith.constant 1 : i32
    %0 = arith.muli %arg0, %c1_i32 : i32
    %c0 = arith.constant 0 : index
    %c0_0 = arith.constant 0 : index
    %c0_1 = arith.constant 0 : index
    %1 = vector.load %arg2[%c0, %c0_0, %c0_1] : memref<1x8x12xf32, #tpu.memory_space<vmem>>, vector<1x8x12xf32>
    %2 = vector.shape_cast %1 : vector<1x8x12xf32> to vector<8x12xf32>
    %3 = arith.truncf %2 : vector<8x12xf32> to vector<8x12xbf16>
    %c0_2 = arith.constant 0 : index
    %c0_3 = arith.constant 0 : index
    %4 = vector.load %arg3[%c0_2, %c0_3] : memref<12x32xbf16, #tpu.memory_space<vmem>>, vector<12x32xbf16>
    %cst = arith.constant dense<0.000000e+00> : vector<8x32xf32>
    %5 = tpu.matmul %3, %4, %cst {dimension_numbers = #tpu.dot_dimension_numbers<[1], [0], [0], [1], [0, 0, 1, 1], [], []>} : vector<8x12xbf16>, vector<12x32xbf16>, vector<8x32xf32> -> vector<8x32xf32>
    %c0_4 = arith.constant 0 : index
    %c0_5 = arith.constant 0 : index
    %6 = vector.load %arg4[%c0_4, %c0_5] : memref<1x32xf32, #tpu.memory_space<vmem>>, vector<1x32xf32>
    %7 = vector.broadcast %6 : vector<1x32xf32> to vector<8x32xf32>
    %8 = arith.addf %5, %7 : vector<8x32xf32>
    %9 = vector.shape_cast %8 : vector<8x32xf32> to vector<1x8x32xf32>
    %c0_6 = arith.constant 0 : index
    %c0_7 = arith.constant 0 : index
    %10 = vector.load %arg5[%c0_6, %c0_7] : memref<8x32xf32, #tpu.memory_space<vmem>>, vector<8x32xf32>
    %11 = vector.shape_cast %10 : vector<8x32xf32> to vector<1x8x32xf32>
    %12 = arith.addf %9, %11 : vector<1x8x32xf32>
    %13 = vector.shape_cast %12 : vector<1x8x32xf32> to vector<8x32xf32>
    %14 = arith.truncf %13 : vector<8x32xf32> to vector<8x32xbf16>
    %c0_i32 = arith.constant 0 : i32
    %15 = arith.addi %0, %c0_i32 : i32
    %16 = arith.index_cast %15 : i32 to index
    %17 = memref.load %arg1[%16] : memref<2xi32, #tpu.memory_space<smem>>
    %18 = vector.broadcast %17 : i32 to vector<1x1x1xi32>
    %19 = tpu.iota {dimensions = array<i32: 2>} : vector<1x1x8xi32>
    %20 = vector.broadcast %18 : vector<1x1x1xi32> to vector<1x1x8xi32>
    %21 = arith.cmpi slt, %19, %20 : vector<1x1x8xi32>
    %cst_8 = arith.constant 0.000000e+00 : f32
    %22 = vector.broadcast %cst_8 : f32 to vector<8x32xf32>
    %c0_9 = arith.constant 0 : index
    %c0_10 = arith.constant 0 : index
    %c0_11 = arith.constant 0 : index
    %23 = vector.load %arg6[%c0_9, %c0_10, %c0_11] : memref<4x32x8xbf16, #tpu.memory_space<vmem>>, vector<1x32x8xbf16>
    %24 = vector.shape_cast %23 : vector<1x32x8xbf16> to vector<32x8xbf16>
    %cst_12 = arith.constant dense<0.000000e+00> : vector<8x8xf32>
    %25 = tpu.matmul %14, %24, %cst_12 {dimension_numbers = #tpu.dot_dimension_numbers<[1], [0], [0], [1], [0, 0, 1, 1], [], []>} : vector<8x32xbf16>, vector<32x8xbf16>, vector<8x8xf32> -> vector<8x8xf32>
    %c0_13 = arith.constant 0 : index
    %c0_14 = arith.constant 0 : index
    %c0_15 = arith.constant 0 : index
    %26 = vector.load %arg10[%c0_13, %c0_14, %c0_15] : memref<4x1x8xf32, #tpu.memory_space<vmem>>, vector<1x1x8xf32>
    %27 = vector.shape_cast %26 : vector<1x1x8xf32> to vector<1x8xf32>
    %28 = vector.broadcast %27 : vector<1x8xf32> to vector<8x8xf32>
    %29 = arith.addf %25, %28 : vector<8x8xf32>
    %cst_16 = arith.constant 0.353553385 : f32
    %30 = vector.broadcast %cst_16 : f32 to vector<8x8xf32>
    %31 = arith.mulf %29, %30 : vector<8x8xf32>
    %c0_17 = arith.constant 0 : index
    %c0_18 = arith.constant 0 : index
    %c0_19 = arith.constant 0 : index
    %32 = vector.load %arg7[%c0_17, %c0_18, %c0_19] : memref<4x32x8xbf16, #tpu.memory_space<vmem>>, vector<1x32x8xbf16>
    %33 = vector.shape_cast %32 : vector<1x32x8xbf16> to vector<32x8xbf16>
    %cst_20 = arith.constant dense<0.000000e+00> : vector<8x8xf32>
    %34 = tpu.matmul %14, %33, %cst_20 {dimension_numbers = #tpu.dot_dimension_numbers<[1], [0], [0], [1], [0, 0, 1, 1], [], []>} : vector<8x32xbf16>, vector<32x8xbf16>, vector<8x8xf32> -> vector<8x8xf32>
    %c0_21 = arith.constant 0 : index
    %c0_22 = arith.constant 0 : index
    %c0_23 = arith.constant 0 : index
    %35 = vector.load %arg11[%c0_21, %c0_22, %c0_23] : memref<4x1x8xf32, #tpu.memory_space<vmem>>, vector<1x1x8xf32>
    %36 = vector.shape_cast %35 : vector<1x1x8xf32> to vector<1x8xf32>
    %37 = vector.broadcast %36 : vector<1x8xf32> to vector<8x8xf32>
    %38 = arith.addf %34, %37 : vector<8x8xf32>
    %c0_24 = arith.constant 0 : index
    %c0_25 = arith.constant 0 : index
    %c0_26 = arith.constant 0 : index
    %39 = vector.load %arg8[%c0_24, %c0_25, %c0_26] : memref<4x32x8xbf16, #tpu.memory_space<vmem>>, vector<1x32x8xbf16>
    %40 = vector.shape_cast %39 : vector<1x32x8xbf16> to vector<32x8xbf16>
    %cst_27 = arith.constant dense<0.000000e+00> : vector<8x8xf32>
    %41 = tpu.matmul %14, %40, %cst_27 {dimension_numbers = #tpu.dot_dimension_numbers<[1], [0], [0], [1], [0, 0, 1, 1], [], []>} : vector<8x32xbf16>, vector<32x8xbf16>, vector<8x8xf32> -> vector<8x8xf32>
    %c0_28 = arith.constant 0 : index
    %c0_29 = arith.constant 0 : index
    %c0_30 = arith.constant 0 : index
    %42 = vector.load %arg12[%c0_28, %c0_29, %c0_30] : memref<4x1x8xf32, #tpu.memory_space<vmem>>, vector<1x1x8xf32>
    %43 = vector.shape_cast %42 : vector<1x1x8xf32> to vector<1x8xf32>
    %44 = vector.broadcast %43 : vector<1x8xf32> to vector<8x8xf32>
    %45 = arith.addf %41, %44 : vector<8x8xf32>
    %46 = vector.shape_cast %31 : vector<8x8xf32> to vector<1x8x8xf32>
    %47 = arith.truncf %46 : vector<1x8x8xf32> to vector<1x8x8xbf16>
    %48 = vector.shape_cast %38 : vector<8x8xf32> to vector<1x8x8xf32>
    %49 = arith.truncf %48 : vector<1x8x8xf32> to vector<1x8x8xbf16>
    %50 = vector.shape_cast %45 : vector<8x8xf32> to vector<1x8x8xf32>
    %51 = arith.truncf %50 : vector<1x8x8xf32> to vector<1x8x8xbf16>
    "tpu.trace_start"() <{level = 10 : i32, message = "bqd,bkd->bqk"}> : () -> ()
    %cst_31 = arith.constant dense<0.000000e+00> : vector<1x8x8xf32>
    %52 = tpu.matmul %47, %49, %cst_31 {dimension_numbers = #tpu.dot_dimension_numbers<[2], [2], [1], [1], [0, 0, 0, 1, 1, 1], [0], [0]>} : vector<1x8x8xbf16>, vector<1x8x8xbf16>, vector<1x8x8xf32> -> vector<1x8x8xf32>
    %cst_32 = arith.constant -1.000000e+30 : f32
    "tpu.trace_stop"() : () -> ()
    %53 = vector.shape_cast %21 : vector<1x1x8xi1> to vector<1x1x8xi1>
    %54 = vector.broadcast %53 : vector<1x1x8xi1> to vector<1x8x8xi1>
    %55 = vector.broadcast %cst_32 : f32 to vector<1x8x8xf32>
    %56 = arith.select %54, %52, %55 : vector<1x8x8xi1>, vector<1x8x8xf32>
    %cst_33 = arith.constant dense<0xFF800000> : vector<1x8xf32>
    %57 = vector.multi_reduction <maximumf>, %56, %cst_33 [2] : vector<1x8x8xf32> to vector<1x8xf32>
    %58 = vector.shape_cast %57 : vector<1x8xf32> to vector<1x8x1xf32>
    %59 = vector.broadcast %58 : vector<1x8x1xf32> to vector<1x8x8xf32>
    %60 = arith.subf %56, %59 : vector<1x8x8xf32>
    %61 = math.exp %60 : vector<1x8x8xf32>
    %cst_34 = arith.constant dense<0.000000e+00> : vector<1x8xf32>
    %62 = vector.multi_reduction <add>, %61, %cst_34 [2] : vector<1x8x8xf32> to vector<1x8xf32>
    %63 = vector.shape_cast %62 : vector<1x8xf32> to vector<1x8x1xf32>
    %64 = vector.broadcast %63 : vector<1x8x1xf32> to vector<1x8x8xf32>
    %65 = arith.divf %61, %64 : vector<1x8x8xf32>
    %66 = arith.truncf %65 : vector<1x8x8xf32> to vector<1x8x8xbf16>
    "tpu.trace_start"() <{level = 10 : i32, message = "bqk,bkd->bqd"}> : () -> ()
    %cst_35 = arith.constant dense<0.000000e+00> : vector<1x8x8xf32>
    %67 = tpu.matmul %66, %51, %cst_35 {dimension_numbers = #tpu.dot_dimension_numbers<[2], [1], [1], [2], [0, 0, 0, 1, 1, 2], [0], [0]>} : vector<1x8x8xbf16>, vector<1x8x8xbf16>, vector<1x8x8xf32> -> vector<1x8x8xf32>
    "tpu.trace_stop"() : () -> ()
    %68 = vector.shape_cast %67 : vector<1x8x8xf32> to vector<8x8xf32>
    %69 = arith.truncf %68 : vector<8x8xf32> to vector<8x8xbf16>
    %c0_36 = arith.constant 0 : index
    %c0_37 = arith.constant 0 : index
    %c0_38 = arith.constant 0 : index
    %70 = vector.load %arg9[%c0_36, %c0_37, %c0_38] : memref<4x8x32xbf16, #tpu.memory_space<vmem>>, vector<1x8x32xbf16>
    %71 = vector.shape_cast %70 : vector<1x8x32xbf16> to vector<8x32xbf16>
    %cst_39 = arith.constant dense<0.000000e+00> : vector<8x32xf32>
    %72 = tpu.matmul %69, %71, %cst_39 {dimension_numbers = #tpu.dot_dimension_numbers<[1], [0], [0], [1], [0, 0, 1, 1], [], []>} : vector<8x8xbf16>, vector<8x32xbf16>, vector<8x32xf32> -> vector<8x32xf32>
    %73 = arith.addf %22, %72 : vector<8x32xf32>
    %c1 = arith.constant 1 : index
    %c0_40 = arith.constant 0 : index
    %c0_41 = arith.constant 0 : index
    %74 = vector.load %arg6[%c1, %c0_40, %c0_41] : memref<4x32x8xbf16, #tpu.memory_space<vmem>>, vector<1x32x8xbf16>
    %75 = vector.shape_cast %74 : vector<1x32x8xbf16> to vector<32x8xbf16>
    %cst_42 = arith.constant dense<0.000000e+00> : vector<8x8xf32>
    %76 = tpu.matmul %14, %75, %cst_42 {dimension_numbers = #tpu.dot_dimension_numbers<[1], [0], [0], [1], [0, 0, 1, 1], [], []>} : vector<8x32xbf16>, vector<32x8xbf16>, vector<8x8xf32> -> vector<8x8xf32>
    %c1_43 = arith.constant 1 : index
    %c0_44 = arith.constant 0 : index
    %c0_45 = arith.constant 0 : index
    %77 = vector.load %arg10[%c1_43, %c0_44, %c0_45] : memref<4x1x8xf32, #tpu.memory_space<vmem>>, vector<1x1x8xf32>
    %78 = vector.shape_cast %77 : vector<1x1x8xf32> to vector<1x8xf32>
    %79 = vector.broadcast %78 : vector<1x8xf32> to vector<8x8xf32>
    %80 = arith.addf %76, %79 : vector<8x8xf32>
    %cst_46 = arith.constant 0.353553385 : f32
    %81 = vector.broadcast %cst_46 : f32 to vector<8x8xf32>
    %82 = arith.mulf %80, %81 : vector<8x8xf32>
    %c1_47 = arith.constant 1 : index
    %c0_48 = arith.constant 0 : index
    %c0_49 = arith.constant 0 : index
    %83 = vector.load %arg7[%c1_47, %c0_48, %c0_49] : memref<4x32x8xbf16, #tpu.memory_space<vmem>>, vector<1x32x8xbf16>
    %84 = vector.shape_cast %83 : vector<1x32x8xbf16> to vector<32x8xbf16>
    %cst_50 = arith.constant dense<0.000000e+00> : vector<8x8xf32>
    %85 = tpu.matmul %14, %84, %cst_50 {dimension_numbers = #tpu.dot_dimension_numbers<[1], [0], [0], [1], [0, 0, 1, 1], [], []>} : vector<8x32xbf16>, vector<32x8xbf16>, vector<8x8xf32> -> vector<8x8xf32>
    %c1_51 = arith.constant 1 : index
    %c0_52 = arith.constant 0 : index
    %c0_53 = arith.constant 0 : index
    %86 = vector.load %arg11[%c1_51, %c0_52, %c0_53] : memref<4x1x8xf32, #tpu.memory_space<vmem>>, vector<1x1x8xf32>
    %87 = vector.shape_cast %86 : vector<1x1x8xf32> to vector<1x8xf32>
    %88 = vector.broadcast %87 : vector<1x8xf32> to vector<8x8xf32>
    %89 = arith.addf %85, %88 : vector<8x8xf32>
    %c1_54 = arith.constant 1 : index
    %c0_55 = arith.constant 0 : index
    %c0_56 = arith.constant 0 : index
    %90 = vector.load %arg8[%c1_54, %c0_55, %c0_56] : memref<4x32x8xbf16, #tpu.memory_space<vmem>>, vector<1x32x8xbf16>
    %91 = vector.shape_cast %90 : vector<1x32x8xbf16> to vector<32x8xbf16>
    %cst_57 = arith.constant dense<0.000000e+00> : vector<8x8xf32>
    %92 = tpu.matmul %14, %91, %cst_57 {dimension_numbers = #tpu.dot_dimension_numbers<[1], [0], [0], [1], [0, 0, 1, 1], [], []>} : vector<8x32xbf16>, vector<32x8xbf16>, vector<8x8xf32> -> vector<8x8xf32>
    %c1_58 = arith.constant 1 : index
    %c0_59 = arith.constant 0 : index
    %c0_60 = arith.constant 0 : index
    %93 = vector.load %arg12[%c1_58, %c0_59, %c0_60] : memref<4x1x8xf32, #tpu.memory_space<vmem>>, vector<1x1x8xf32>
    %94 = vector.shape_cast %93 : vector<1x1x8xf32> to vector<1x8xf32>
    %95 = vector.broadcast %94 : vector<1x8xf32> to vector<8x8xf32>
    %96 = arith.addf %92, %95 : vector<8x8xf32>
    %97 = vector.shape_cast %82 : vector<8x8xf32> to vector<1x8x8xf32>
    %98 = arith.truncf %97 : vector<1x8x8xf32> to vector<1x8x8xbf16>
    %99 = vector.shape_cast %89 : vector<8x8xf32> to vector<1x8x8xf32>
    %100 = arith.truncf %99 : vector<1x8x8xf32> to vector<1x8x8xbf16>
    %101 = vector.shape_cast %96 : vector<8x8xf32> to vector<1x8x8xf32>
    %102 = arith.truncf %101 : vector<1x8x8xf32> to vector<1x8x8xbf16>
    "tpu.trace_start"() <{level = 10 : i32, message = "bqd,bkd->bqk"}> : () -> ()
    %cst_61 = arith.constant dense<0.000000e+00> : vector<1x8x8xf32>
    %103 = tpu.matmul %98, %100, %cst_61 {dimension_numbers = #tpu.dot_dimension_numbers<[2], [2], [1], [1], [0, 0, 0, 1, 1, 1], [0], [0]>} : vector<1x8x8xbf16>, vector<1x8x8xbf16>, vector<1x8x8xf32> -> vector<1x8x8xf32>
    %cst_62 = arith.constant -1.000000e+30 : f32
    "tpu.trace_stop"() : () -> ()
    %104 = vector.shape_cast %21 : vector<1x1x8xi1> to vector<1x1x8xi1>
    %105 = vector.broadcast %104 : vector<1x1x8xi1> to vector<1x8x8xi1>
    %106 = vector.broadcast %cst_62 : f32 to vector<1x8x8xf32>
    %107 = arith.select %105, %103, %106 : vector<1x8x8xi1>, vector<1x8x8xf32>
    %cst_63 = arith.constant dense<0xFF800000> : vector<1x8xf32>
    %108 = vector.multi_reduction <maximumf>, %107, %cst_63 [2] : vector<1x8x8xf32> to vector<1x8xf32>
    %109 = vector.shape_cast %108 : vector<1x8xf32> to vector<1x8x1xf32>
    %110 = vector.broadcast %109 : vector<1x8x1xf32> to vector<1x8x8xf32>
    %111 = arith.subf %107, %110 : vector<1x8x8xf32>
    %112 = math.exp %111 : vector<1x8x8xf32>
    %cst_64 = arith.constant dense<0.000000e+00> : vector<1x8xf32>
    %113 = vector.multi_reduction <add>, %112, %cst_64 [2] : vector<1x8x8xf32> to vector<1x8xf32>
    %114 = vector.shape_cast %113 : vector<1x8xf32> to vector<1x8x1xf32>
    %115 = vector.broadcast %114 : vector<1x8x1xf32> to vector<1x8x8xf32>
    %116 = arith.divf %112, %115 : vector<1x8x8xf32>
    %117 = arith.truncf %116 : vector<1x8x8xf32> to vector<1x8x8xbf16>
    "tpu.trace_start"() <{level = 10 : i32, message = "bqk,bkd->bqd"}> : () -> ()
    %cst_65 = arith.constant dense<0.000000e+00> : vector<1x8x8xf32>
    %118 = tpu.matmul %117, %102, %cst_65 {dimension_numbers = #tpu.dot_dimension_numbers<[2], [1], [1], [2], [0, 0, 0, 1, 1, 2], [0], [0]>} : vector<1x8x8xbf16>, vector<1x8x8xbf16>, vector<1x8x8xf32> -> vector<1x8x8xf32>
    "tpu.trace_stop"() : () -> ()
    %119 = vector.shape_cast %118 : vector<1x8x8xf32> to vector<8x8xf32>
    %120 = arith.truncf %119 : vector<8x8xf32> to vector<8x8xbf16>
    %c1_66 = arith.constant 1 : index
    %c0_67 = arith.constant 0 : index
    %c0_68 = arith.constant 0 : index
    %121 = vector.load %arg9[%c1_66, %c0_67, %c0_68] : memref<4x8x32xbf16, #tpu.memory_space<vmem>>, vector<1x8x32xbf16>
    %122 = vector.shape_cast %121 : vector<1x8x32xbf16> to vector<8x32xbf16>
    %cst_69 = arith.constant dense<0.000000e+00> : vector<8x32xf32>
    %123 = tpu.matmul %120, %122, %cst_69 {dimension_numbers = #tpu.dot_dimension_numbers<[1], [0], [0], [1], [0, 0, 1, 1], [], []>} : vector<8x8xbf16>, vector<8x32xbf16>, vector<8x32xf32> -> vector<8x32xf32>
    %124 = arith.addf %73, %123 : vector<8x32xf32>
    %c2 = arith.constant 2 : index
    %c0_70 = arith.constant 0 : index
    %c0_71 = arith.constant 0 : index
    %125 = vector.load %arg6[%c2, %c0_70, %c0_71] : memref<4x32x8xbf16, #tpu.memory_space<vmem>>, vector<1x32x8xbf16>
    %126 = vector.shape_cast %125 : vector<1x32x8xbf16> to vector<32x8xbf16>
    %cst_72 = arith.constant dense<0.000000e+00> : vector<8x8xf32>
    %127 = tpu.matmul %14, %126, %cst_72 {dimension_numbers = #tpu.dot_dimension_numbers<[1], [0], [0], [1], [0, 0, 1, 1], [], []>} : vector<8x32xbf16>, vector<32x8xbf16>, vector<8x8xf32> -> vector<8x8xf32>
    %c2_73 = arith.constant 2 : index
    %c0_74 = arith.constant 0 : index
    %c0_75 = arith.constant 0 : index
    %128 = vector.load %arg10[%c2_73, %c0_74, %c0_75] : memref<4x1x8xf32, #tpu.memory_space<vmem>>, vector<1x1x8xf32>
    %129 = vector.shape_cast %128 : vector<1x1x8xf32> to vector<1x8xf32>
    %130 = vector.broadcast %129 : vector<1x8xf32> to vector<8x8xf32>
    %131 = arith.addf %127, %130 : vector<8x8xf32>
    %cst_76 = arith.constant 0.353553385 : f32
    %132 = vector.broadcast %cst_76 : f32 to vector<8x8xf32>
    %133 = arith.mulf %131, %132 : vector<8x8xf32>
    %c2_77 = arith.constant 2 : index
    %c0_78 = arith.constant 0 : index
    %c0_79 = arith.constant 0 : index
    %134 = vector.load %arg7[%c2_77, %c0_78, %c0_79] : memref<4x32x8xbf16, #tpu.memory_space<vmem>>, vector<1x32x8xbf16>
    %135 = vector.shape_cast %134 : vector<1x32x8xbf16> to vector<32x8xbf16>
    %cst_80 = arith.constant dense<0.000000e+00> : vector<8x8xf32>
    %136 = tpu.matmul %14, %135, %cst_80 {dimension_numbers = #tpu.dot_dimension_numbers<[1], [0], [0], [1], [0, 0, 1, 1], [], []>} : vector<8x32xbf16>, vector<32x8xbf16>, vector<8x8xf32> -> vector<8x8xf32>
    %c2_81 = arith.constant 2 : index
    %c0_82 = arith.constant 0 : index
    %c0_83 = arith.constant 0 : index
    %137 = vector.load %arg11[%c2_81, %c0_82, %c0_83] : memref<4x1x8xf32, #tpu.memory_space<vmem>>, vector<1x1x8xf32>
    %138 = vector.shape_cast %137 : vector<1x1x8xf32> to vector<1x8xf32>
    %139 = vector.broadcast %138 : vector<1x8xf32> to vector<8x8xf32>
    %140 = arith.addf %136, %139 : vector<8x8xf32>
    %c2_84 = arith.constant 2 : index
    %c0_85 = arith.constant 0 : index
    %c0_86 = arith.constant 0 : index
    %141 = vector.load %arg8[%c2_84, %c0_85, %c0_86] : memref<4x32x8xbf16, #tpu.memory_space<vmem>>, vector<1x32x8xbf16>
    %142 = vector.shape_cast %141 : vector<1x32x8xbf16> to vector<32x8xbf16>
    %cst_87 = arith.constant dense<0.000000e+00> : vector<8x8xf32>
    %143 = tpu.matmul %14, %142, %cst_87 {dimension_numbers = #tpu.dot_dimension_numbers<[1], [0], [0], [1], [0, 0, 1, 1], [], []>} : vector<8x32xbf16>, vector<32x8xbf16>, vector<8x8xf32> -> vector<8x8xf32>
    %c2_88 = arith.constant 2 : index
    %c0_89 = arith.constant 0 : index
    %c0_90 = arith.constant 0 : index
    %144 = vector.load %arg12[%c2_88, %c0_89, %c0_90] : memref<4x1x8xf32, #tpu.memory_space<vmem>>, vector<1x1x8xf32>
    %145 = vector.shape_cast %144 : vector<1x1x8xf32> to vector<1x8xf32>
    %146 = vector.broadcast %145 : vector<1x8xf32> to vector<8x8xf32>
    %147 = arith.addf %143, %146 : vector<8x8xf32>
    %148 = vector.shape_cast %133 : vector<8x8xf32> to vector<1x8x8xf32>
    %149 = arith.truncf %148 : vector<1x8x8xf32> to vector<1x8x8xbf16>
    %150 = vector.shape_cast %140 : vector<8x8xf32> to vector<1x8x8xf32>
    %151 = arith.truncf %150 : vector<1x8x8xf32> to vector<1x8x8xbf16>
    %152 = vector.shape_cast %147 : vector<8x8xf32> to vector<1x8x8xf32>
    %153 = arith.truncf %152 : vector<1x8x8xf32> to vector<1x8x8xbf16>
    "tpu.trace_start"() <{level = 10 : i32, message = "bqd,bkd->bqk"}> : () -> ()
    %cst_91 = arith.constant dense<0.000000e+00> : vector<1x8x8xf32>
    %154 = tpu.matmul %149, %151, %cst_91 {dimension_numbers = #tpu.dot_dimension_numbers<[2], [2], [1], [1], [0, 0, 0, 1, 1, 1], [0], [0]>} : vector<1x8x8xbf16>, vector<1x8x8xbf16>, vector<1x8x8xf32> -> vector<1x8x8xf32>
    %cst_92 = arith.constant -1.000000e+30 : f32
    "tpu.trace_stop"() : () -> ()
    %155 = vector.shape_cast %21 : vector<1x1x8xi1> to vector<1x1x8xi1>
    %156 = vector.broadcast %155 : vector<1x1x8xi1> to vector<1x8x8xi1>
    %157 = vector.broadcast %cst_92 : f32 to vector<1x8x8xf32>
    %158 = arith.select %156, %154, %157 : vector<1x8x8xi1>, vector<1x8x8xf32>
    %cst_93 = arith.constant dense<0xFF800000> : vector<1x8xf32>
    %159 = vector.multi_reduction <maximumf>, %158, %cst_93 [2] : vector<1x8x8xf32> to vector<1x8xf32>
    %160 = vector.shape_cast %159 : vector<1x8xf32> to vector<1x8x1xf32>
    %161 = vector.broadcast %160 : vector<1x8x1xf32> to vector<1x8x8xf32>
    %162 = arith.subf %158, %161 : vector<1x8x8xf32>
    %163 = math.exp %162 : vector<1x8x8xf32>
    %cst_94 = arith.constant dense<0.000000e+00> : vector<1x8xf32>
    %164 = vector.multi_reduction <add>, %163, %cst_94 [2] : vector<1x8x8xf32> to vector<1x8xf32>
    %165 = vector.shape_cast %164 : vector<1x8xf32> to vector<1x8x1xf32>
    %166 = vector.broadcast %165 : vector<1x8x1xf32> to vector<1x8x8xf32>
    %167 = arith.divf %163, %166 : vector<1x8x8xf32>
    %168 = arith.truncf %167 : vector<1x8x8xf32> to vector<1x8x8xbf16>
    "tpu.trace_start"() <{level = 10 : i32, message = "bqk,bkd->bqd"}> : () -> ()
    %cst_95 = arith.constant dense<0.000000e+00> : vector<1x8x8xf32>
    %169 = tpu.matmul %168, %153, %cst_95 {dimension_numbers = #tpu.dot_dimension_numbers<[2], [1], [1], [2], [0, 0, 0, 1, 1, 2], [0], [0]>} : vector<1x8x8xbf16>, vector<1x8x8xbf16>, vector<1x8x8xf32> -> vector<1x8x8xf32>
    "tpu.trace_stop"() : () -> ()
    %170 = vector.shape_cast %169 : vector<1x8x8xf32> to vector<8x8xf32>
    %171 = arith.truncf %170 : vector<8x8xf32> to vector<8x8xbf16>
    %c2_96 = arith.constant 2 : index
    %c0_97 = arith.constant 0 : index
    %c0_98 = arith.constant 0 : index
    %172 = vector.load %arg9[%c2_96, %c0_97, %c0_98] : memref<4x8x32xbf16, #tpu.memory_space<vmem>>, vector<1x8x32xbf16>
    %173 = vector.shape_cast %172 : vector<1x8x32xbf16> to vector<8x32xbf16>
    %cst_99 = arith.constant dense<0.000000e+00> : vector<8x32xf32>
    %174 = tpu.matmul %171, %173, %cst_99 {dimension_numbers = #tpu.dot_dimension_numbers<[1], [0], [0], [1], [0, 0, 1, 1], [], []>} : vector<8x8xbf16>, vector<8x32xbf16>, vector<8x32xf32> -> vector<8x32xf32>
    %175 = arith.addf %124, %174 : vector<8x32xf32>
    %c3 = arith.constant 3 : index
    %c0_100 = arith.constant 0 : index
    %c0_101 = arith.constant 0 : index
    %176 = vector.load %arg6[%c3, %c0_100, %c0_101] : memref<4x32x8xbf16, #tpu.memory_space<vmem>>, vector<1x32x8xbf16>
    %177 = vector.shape_cast %176 : vector<1x32x8xbf16> to vector<32x8xbf16>
    %cst_102 = arith.constant dense<0.000000e+00> : vector<8x8xf32>
    %178 = tpu.matmul %14, %177, %cst_102 {dimension_numbers = #tpu.dot_dimension_numbers<[1], [0], [0], [1], [0, 0, 1, 1], [], []>} : vector<8x32xbf16>, vector<32x8xbf16>, vector<8x8xf32> -> vector<8x8xf32>
    %c3_103 = arith.constant 3 : index
    %c0_104 = arith.constant 0 : index
    %c0_105 = arith.constant 0 : index
    %179 = vector.load %arg10[%c3_103, %c0_104, %c0_105] : memref<4x1x8xf32, #tpu.memory_space<vmem>>, vector<1x1x8xf32>
    %180 = vector.shape_cast %179 : vector<1x1x8xf32> to vector<1x8xf32>
    %181 = vector.broadcast %180 : vector<1x8xf32> to vector<8x8xf32>
    %182 = arith.addf %178, %181 : vector<8x8xf32>
    %cst_106 = arith.constant 0.353553385 : f32
    %183 = vector.broadcast %cst_106 : f32 to vector<8x8xf32>
    %184 = arith.mulf %182, %183 : vector<8x8xf32>
    %c3_107 = arith.constant 3 : index
    %c0_108 = arith.constant 0 : index
    %c0_109 = arith.constant 0 : index
    %185 = vector.load %arg7[%c3_107, %c0_108, %c0_109] : memref<4x32x8xbf16, #tpu.memory_space<vmem>>, vector<1x32x8xbf16>
    %186 = vector.shape_cast %185 : vector<1x32x8xbf16> to vector<32x8xbf16>
    %cst_110 = arith.constant dense<0.000000e+00> : vector<8x8xf32>
    %187 = tpu.matmul %14, %186, %cst_110 {dimension_numbers = #tpu.dot_dimension_numbers<[1], [0], [0], [1], [0, 0, 1, 1], [], []>} : vector<8x32xbf16>, vector<32x8xbf16>, vector<8x8xf32> -> vector<8x8xf32>
    %c3_111 = arith.constant 3 : index
    %c0_112 = arith.constant 0 : index
    %c0_113 = arith.constant 0 : index
    %188 = vector.load %arg11[%c3_111, %c0_112, %c0_113] : memref<4x1x8xf32, #tpu.memory_space<vmem>>, vector<1x1x8xf32>
    %189 = vector.shape_cast %188 : vector<1x1x8xf32> to vector<1x8xf32>
    %190 = vector.broadcast %189 : vector<1x8xf32> to vector<8x8xf32>
    %191 = arith.addf %187, %190 : vector<8x8xf32>
    %c3_114 = arith.constant 3 : index
    %c0_115 = arith.constant 0 : index
    %c0_116 = arith.constant 0 : index
    %192 = vector.load %arg8[%c3_114, %c0_115, %c0_116] : memref<4x32x8xbf16, #tpu.memory_space<vmem>>, vector<1x32x8xbf16>
    %193 = vector.shape_cast %192 : vector<1x32x8xbf16> to vector<32x8xbf16>
    %cst_117 = arith.constant dense<0.000000e+00> : vector<8x8xf32>
    %194 = tpu.matmul %14, %193, %cst_117 {dimension_numbers = #tpu.dot_dimension_numbers<[1], [0], [0], [1], [0, 0, 1, 1], [], []>} : vector<8x32xbf16>, vector<32x8xbf16>, vector<8x8xf32> -> vector<8x8xf32>
    %c3_118 = arith.constant 3 : index
    %c0_119 = arith.constant 0 : index
    %c0_120 = arith.constant 0 : index
    %195 = vector.load %arg12[%c3_118, %c0_119, %c0_120] : memref<4x1x8xf32, #tpu.memory_space<vmem>>, vector<1x1x8xf32>
    %196 = vector.shape_cast %195 : vector<1x1x8xf32> to vector<1x8xf32>
    %197 = vector.broadcast %196 : vector<1x8xf32> to vector<8x8xf32>
    %198 = arith.addf %194, %197 : vector<8x8xf32>
    %199 = vector.shape_cast %184 : vector<8x8xf32> to vector<1x8x8xf32>
    %200 = arith.truncf %199 : vector<1x8x8xf32> to vector<1x8x8xbf16>
    %201 = vector.shape_cast %191 : vector<8x8xf32> to vector<1x8x8xf32>
    %202 = arith.truncf %201 : vector<1x8x8xf32> to vector<1x8x8xbf16>
    %203 = vector.shape_cast %198 : vector<8x8xf32> to vector<1x8x8xf32>
    %204 = arith.truncf %203 : vector<1x8x8xf32> to vector<1x8x8xbf16>
    "tpu.trace_start"() <{level = 10 : i32, message = "bqd,bkd->bqk"}> : () -> ()
    %cst_121 = arith.constant dense<0.000000e+00> : vector<1x8x8xf32>
    %205 = tpu.matmul %200, %202, %cst_121 {dimension_numbers = #tpu.dot_dimension_numbers<[2], [2], [1], [1], [0, 0, 0, 1, 1, 1], [0], [0]>} : vector<1x8x8xbf16>, vector<1x8x8xbf16>, vector<1x8x8xf32> -> vector<1x8x8xf32>
    %cst_122 = arith.constant -1.000000e+30 : f32
    "tpu.trace_stop"() : () -> ()
    %206 = vector.shape_cast %21 : vector<1x1x8xi1> to vector<1x1x8xi1>
    %207 = vector.broadcast %206 : vector<1x1x8xi1> to vector<1x8x8xi1>
    %208 = vector.broadcast %cst_122 : f32 to vector<1x8x8xf32>
    %209 = arith.select %207, %205, %208 : vector<1x8x8xi1>, vector<1x8x8xf32>
    %cst_123 = arith.constant dense<0xFF800000> : vector<1x8xf32>
    %210 = vector.multi_reduction <maximumf>, %209, %cst_123 [2] : vector<1x8x8xf32> to vector<1x8xf32>
    %211 = vector.shape_cast %210 : vector<1x8xf32> to vector<1x8x1xf32>
    %212 = vector.broadcast %211 : vector<1x8x1xf32> to vector<1x8x8xf32>
    %213 = arith.subf %209, %212 : vector<1x8x8xf32>
    %214 = math.exp %213 : vector<1x8x8xf32>
    %cst_124 = arith.constant dense<0.000000e+00> : vector<1x8xf32>
    %215 = vector.multi_reduction <add>, %214, %cst_124 [2] : vector<1x8x8xf32> to vector<1x8xf32>
    %216 = vector.shape_cast %215 : vector<1x8xf32> to vector<1x8x1xf32>
    %217 = vector.broadcast %216 : vector<1x8x1xf32> to vector<1x8x8xf32>
    %218 = arith.divf %214, %217 : vector<1x8x8xf32>
    %219 = arith.truncf %218 : vector<1x8x8xf32> to vector<1x8x8xbf16>
    "tpu.trace_start"() <{level = 10 : i32, message = "bqk,bkd->bqd"}> : () -> ()
    %cst_125 = arith.constant dense<0.000000e+00> : vector<1x8x8xf32>
    %220 = tpu.matmul %219, %204, %cst_125 {dimension_numbers = #tpu.dot_dimension_numbers<[2], [1], [1], [2], [0, 0, 0, 1, 1, 2], [0], [0]>} : vector<1x8x8xbf16>, vector<1x8x8xbf16>, vector<1x8x8xf32> -> vector<1x8x8xf32>
    "tpu.trace_stop"() : () -> ()
    %221 = vector.shape_cast %220 : vector<1x8x8xf32> to vector<8x8xf32>
    %222 = arith.truncf %221 : vector<8x8xf32> to vector<8x8xbf16>
    %c3_126 = arith.constant 3 : index
    %c0_127 = arith.constant 0 : index
    %c0_128 = arith.constant 0 : index
    %223 = vector.load %arg9[%c3_126, %c0_127, %c0_128] : memref<4x8x32xbf16, #tpu.memory_space<vmem>>, vector<1x8x32xbf16>
    %224 = vector.shape_cast %223 : vector<1x8x32xbf16> to vector<8x32xbf16>
    %cst_129 = arith.constant dense<0.000000e+00> : vector<8x32xf32>
    %225 = tpu.matmul %222, %224, %cst_129 {dimension_numbers = #tpu.dot_dimension_numbers<[1], [0], [0], [1], [0, 0, 1, 1], [], []>} : vector<8x8xbf16>, vector<8x32xbf16>, vector<8x32xf32> -> vector<8x32xf32>
    %226 = arith.addf %175, %225 : vector<8x32xf32>
    %227 = arith.addf %13, %226 : vector<8x32xf32>
    %c0_130 = arith.constant 0 : index
    %c0_131 = arith.constant 0 : index
    %228 = vector.load %arg13[%c0_130, %c0_131] : memref<1x32xf32, #tpu.memory_space<vmem>>, vector<1x32xf32>
    %229 = vector.broadcast %228 : vector<1x32xf32> to vector<8x32xf32>
    %230 = arith.addf %227, %229 : vector<8x32xf32>
    %cst_132 = arith.constant dense<0.000000e+00> : vector<8xf32>
    %231 = vector.multi_reduction <add>, %230, %cst_132 [1] : vector<8x32xf32> to vector<8xf32>
    %232 = vector.shape_cast %231 : vector<8xf32> to vector<8x1xf32>
    %cst_133 = arith.constant 3.200000e+01 : f32
    %233 = vector.broadcast %cst_133 : f32 to vector<8x1xf32>
    %234 = arith.divf %232, %233 : vector<8x1xf32>
    %235 = vector.broadcast %234 : vector<8x1xf32> to vector<8x32xf32>
    %236 = arith.subf %230, %235 : vector<8x32xf32>
    %237 = arith.mulf %236, %236 : vector<8x32xf32>
    %cst_134 = arith.constant dense<0.000000e+00> : vector<8xf32>
    %238 = vector.multi_reduction <add>, %237, %cst_134 [1] : vector<8x32xf32> to vector<8xf32>
    %239 = vector.shape_cast %238 : vector<8xf32> to vector<8x1xf32>
    %cst_135 = arith.constant 3.200000e+01 : f32
    %240 = vector.broadcast %cst_135 : f32 to vector<8x1xf32>
    %241 = arith.divf %239, %240 : vector<8x1xf32>
    %cst_136 = arith.constant 9.99999974E-6 : f32
    %242 = vector.broadcast %cst_136 : f32 to vector<8x1xf32>
    %243 = arith.addf %241, %242 : vector<8x1xf32>
    %244 = math.rsqrt %243 : vector<8x1xf32>
    %245 = vector.broadcast %244 : vector<8x1xf32> to vector<8x32xf32>
    %246 = arith.mulf %236, %245 : vector<8x32xf32>
    %c0_137 = arith.constant 0 : index
    %c0_138 = arith.constant 0 : index
    %247 = vector.load %arg14[%c0_137, %c0_138] : memref<1x32xf32, #tpu.memory_space<vmem>>, vector<1x32xf32>
    %248 = vector.broadcast %247 : vector<1x32xf32> to vector<8x32xf32>
    %249 = arith.mulf %246, %248 : vector<8x32xf32>
    %c0_139 = arith.constant 0 : index
    %c0_140 = arith.constant 0 : index
    %250 = vector.load %arg15[%c0_139, %c0_140] : memref<1x32xf32, #tpu.memory_space<vmem>>, vector<1x32xf32>
    %251 = vector.broadcast %250 : vector<1x32xf32> to vector<8x32xf32>
    %252 = arith.addf %249, %251 : vector<8x32xf32>
    %253 = arith.truncf %252 : vector<8x32xf32> to vector<8x32xbf16>
    %c0_141 = arith.constant 0 : index
    %c0_142 = arith.constant 0 : index
    %254 = vector.load %arg16[%c0_141, %c0_142] : memref<32x64xbf16, #tpu.memory_space<vmem>>, vector<32x64xbf16>
    %cst_143 = arith.constant dense<0.000000e+00> : vector<8x64xf32>
    %255 = tpu.matmul %253, %254, %cst_143 {dimension_numbers = #tpu.dot_dimension_numbers<[1], [0], [0], [1], [0, 0, 1, 1], [], []>} : vector<8x32xbf16>, vector<32x64xbf16>, vector<8x64xf32> -> vector<8x64xf32>
    %c0_144 = arith.constant 0 : index
    %c0_145 = arith.constant 0 : index
    %256 = vector.load %arg17[%c0_144, %c0_145] : memref<1x64xf32, #tpu.memory_space<vmem>>, vector<1x64xf32>
    %257 = vector.broadcast %256 : vector<1x64xf32> to vector<8x64xf32>
    %258 = arith.addf %255, %257 : vector<8x64xf32>
    %cst_146 = arith.constant 0.000000e+00 : f32
    %259 = vector.broadcast %cst_146 : f32 to vector<8x64xf32>
    %260 = arith.maximumf %258, %259 : vector<8x64xf32>
    %261 = arith.truncf %260 : vector<8x64xf32> to vector<8x64xbf16>
    %c0_147 = arith.constant 0 : index
    %c0_148 = arith.constant 0 : index
    %262 = vector.load %arg18[%c0_147, %c0_148] : memref<64x32xbf16, #tpu.memory_space<vmem>>, vector<64x32xbf16>
    %cst_149 = arith.constant dense<0.000000e+00> : vector<8x32xf32>
    %263 = tpu.matmul %261, %262, %cst_149 {dimension_numbers = #tpu.dot_dimension_numbers<[1], [0], [0], [1], [0, 0, 1, 1], [], []>} : vector<8x64xbf16>, vector<64x32xbf16>, vector<8x32xf32> -> vector<8x32xf32>
    %c0_150 = arith.constant 0 : index
    %c0_151 = arith.constant 0 : index
    %264 = vector.load %arg19[%c0_150, %c0_151] : memref<1x32xf32, #tpu.memory_space<vmem>>, vector<1x32xf32>
    %265 = vector.broadcast %264 : vector<1x32xf32> to vector<8x32xf32>
    %266 = arith.addf %263, %265 : vector<8x32xf32>
    %267 = arith.addf %252, %266 : vector<8x32xf32>
    %cst_152 = arith.constant dense<0.000000e+00> : vector<8xf32>
    %268 = vector.multi_reduction <add>, %267, %cst_152 [1] : vector<8x32xf32> to vector<8xf32>
    %269 = vector.shape_cast %268 : vector<8xf32> to vector<8x1xf32>
    %cst_153 = arith.constant 3.200000e+01 : f32
    %270 = vector.broadcast %cst_153 : f32 to vector<8x1xf32>
    %271 = arith.divf %269, %270 : vector<8x1xf32>
    %272 = vector.broadcast %271 : vector<8x1xf32> to vector<8x32xf32>
    %273 = arith.subf %267, %272 : vector<8x32xf32>
    %274 = arith.mulf %273, %273 : vector<8x32xf32>
    %cst_154 = arith.constant dense<0.000000e+00> : vector<8xf32>
    %275 = vector.multi_reduction <add>, %274, %cst_154 [1] : vector<8x32xf32> to vector<8xf32>
    %276 = vector.shape_cast %275 : vector<8xf32> to vector<8x1xf32>
    %cst_155 = arith.constant 3.200000e+01 : f32
    %277 = vector.broadcast %cst_155 : f32 to vector<8x1xf32>
    %278 = arith.divf %276, %277 : vector<8x1xf32>
    %cst_156 = arith.constant 9.99999974E-6 : f32
    %279 = vector.broadcast %cst_156 : f32 to vector<8x1xf32>
    %280 = arith.addf %278, %279 : vector<8x1xf32>
    %281 = math.rsqrt %280 : vector<8x1xf32>
    %282 = vector.broadcast %281 : vector<8x1xf32> to vector<8x32xf32>
    %283 = arith.mulf %273, %282 : vector<8x32xf32>
    %c0_157 = arith.constant 0 : index
    %c0_158 = arith.constant 0 : index
    %284 = vector.load %arg20[%c0_157, %c0_158] : memref<1x32xf32, #tpu.memory_space<vmem>>, vector<1x32xf32>
    %285 = vector.broadcast %284 : vector<1x32xf32> to vector<8x32xf32>
    %286 = arith.mulf %283, %285 : vector<8x32xf32>
    %c0_159 = arith.constant 0 : index
    %c0_160 = arith.constant 0 : index
    %287 = vector.load %arg21[%c0_159, %c0_160] : memref<1x32xf32, #tpu.memory_space<vmem>>, vector<1x32xf32>
    %288 = vector.broadcast %287 : vector<1x32xf32> to vector<8x32xf32>
    %289 = arith.addf %286, %288 : vector<8x32xf32>
    %290 = vector.shape_cast %289 : vector<8x32xf32> to vector<1x8x32xf32>
    %291 = arith.truncf %290 : vector<1x8x32xf32> to vector<1x8x32xbf16>
    %c0_161 = arith.constant 0 : index
    %c0_162 = arith.constant 0 : index
    %c0_163 = arith.constant 0 : index
    %292 = vector.load %arg22[%c0_161, %c0_162, %c0_163] : memref<1x8x32xbf16, #tpu.memory_space<vmem>>, vector<1x8x32xbf16>
    tpu.vector_store %arg22[%c0_161, %c0_162, %c0_163], %291 {strides = array<i32>} : memref<1x8x32xbf16, #tpu.memory_space<vmem>>, vector<1x8x32xbf16>,
    return
  }
  func.func @transform_0(%arg0: i32, %arg1: memref<2xi32, #tpu.memory_space<smem>>) -> (i32, i32, i32) {
    %c0_i32 = arith.constant 0 : i32
    %c0_i32_0 = arith.constant 0 : i32
    %c0_i32_1 = arith.constant 0 : i32
    return %arg0, %c0_i32, %c0_i32_0 : i32, i32, i32
  }
  func.func @transform_1(%arg0: i32, %arg1: memref<2xi32, #tpu.memory_space<smem>>) -> (i32, i32) {
    %c0_i32 = arith.constant 0 : i32
    %c0_i32_0 = arith.constant 0 : i32
    %c0_i32_1 = arith.constant 0 : i32
    return %c0_i32, %c0_i32_0 : i32, i32
  }
  func.func @transform_2(%arg0: i32, %arg1: memref<2xi32, #tpu.memory_space<smem>>) -> (i32, i32) {
    %c0_i32 = arith.constant 0 : i32
    %c0_i32_0 = arith.constant 0 : i32
    %c0_i32_1 = arith.constant 0 : i32
    return %c0_i32, %c0_i32_0 : i32, i32
  }
  func.func @transform_3(%arg0: i32, %arg1: memref<2xi32, #tpu.memory_space<smem>>) -> (i32, i32) {
    %c0_i32 = arith.constant 0 : i32
    %c0_i32_0 = arith.constant 0 : i32
    %c0_i32_1 = arith.constant 0 : i32
    return %c0_i32, %c0_i32_0 : i32, i32
  }
  func.func @transform_4(%arg0: i32, %arg1: memref<2xi32, #tpu.memory_space<smem>>) -> (i32, i32, i32) {
    %c0_i32 = arith.constant 0 : i32
    %c0_i32_0 = arith.constant 0 : i32
    %c0_i32_1 = arith.constant 0 : i32
    %c0_i32_2 = arith.constant 0 : i32
    return %c0_i32, %c0_i32_0, %c0_i32_1 : i32, i32, i32
  }
  func.func @transform_5(%arg0: i32, %arg1: memref<2xi32, #tpu.memory_space<smem>>) -> (i32, i32, i32) {
    %c0_i32 = arith.constant 0 : i32
    %c0_i32_0 = arith.constant 0 : i32
    %c0_i32_1 = arith.constant 0 : i32
    %c0_i32_2 = arith.constant 0 : i32
    return %c0_i32, %c0_i32_0, %c0_i32_1 : i32, i32, i32
  }
  func.func @transform_6(%arg0: i32, %arg1: memref<2xi32, #tpu.memory_space<smem>>) -> (i32, i32, i32) {
    %c0_i32 = arith.constant 0 : i32
    %c0_i32_0 = arith.constant 0 : i32
    %c0_i32_1 = arith.constant 0 : i32
    %c0_i32_2 = arith.constant 0 : i32
    return %c0_i32, %c0_i32_0, %c0_i32_1 : i32, i32, i32
  }
  func.func @transform_7(%arg0: i32, %arg1: memref<2xi32, #tpu.memory_space<smem>>) -> (i32, i32, i32) {
    %c0_i32 = arith.constant 0 : i32
    %c0_i32_0 = arith.constant 0 : i32
    %c0_i32_1 = arith.constant 0 : i32
    %c0_i32_2 = arith.constant 0 : i32
    return %c0_i32, %c0_i32_0, %c0_i32_1 : i32, i32, i32
  }
  func.func @transform_8(%arg0: i32, %arg1: memref<2xi32, #tpu.memory_space<smem>>) -> (i32, i32, i32) {
    %c0_i32 = arith.constant 0 : i32
    %c0_i32_0 = arith.constant 0 : i32
    %c0_i32_1 = arith.constant 0 : i32
    %c0_i32_2 = arith.constant 0 : i32
    return %c0_i32, %c0_i32_0, %c0_i32_1 : i32, i32, i32
  }
  func.func @transform_9(%arg0: i32, %arg1: memref<2xi32, #tpu.memory_space<smem>>) -> (i32, i32, i32) {
    %c0_i32 = arith.constant 0 : i32
    %c0_i32_0 = arith.constant 0 : i32
    %c0_i32_1 = arith.constant 0 : i32
    %c0_i32_2 = arith.constant 0 : i32
    return %c0_i32, %c0_i32_0, %c0_i32_1 : i32, i32, i32
  }
  func.func @transform_10(%arg0: i32, %arg1: memref<2xi32, #tpu.memory_space<smem>>) -> (i32, i32, i32) {
    %c0_i32 = arith.constant 0 : i32
    %c0_i32_0 = arith.constant 0 : i32
    %c0_i32_1 = arith.constant 0 : i32
    %c0_i32_2 = arith.constant 0 : i32
    return %c0_i32, %c0_i32_0, %c0_i32_1 : i32, i32, i32
  }
  func.func @transform_11(%arg0: i32, %arg1: memref<2xi32, #tpu.memory_space<smem>>) -> (i32, i32) {
    %c0_i32 = arith.constant 0 : i32
    %c0_i32_0 = arith.constant 0 : i32
    %c0_i32_1 = arith.constant 0 : i32
    return %c0_i32, %c0_i32_0 : i32, i32
  }
  func.func @transform_12(%arg0: i32, %arg1: memref<2xi32, #tpu.memory_space<smem>>) -> (i32, i32) {
    %c0_i32 = arith.constant 0 : i32
    %c0_i32_0 = arith.constant 0 : i32
    %c0_i32_1 = arith.constant 0 : i32
    return %c0_i32, %c0_i32_0 : i32, i32
  }
  func.func @transform_13(%arg0: i32, %arg1: memref<2xi32, #tpu.memory_space<smem>>) -> (i32, i32) {
    %c0_i32 = arith.constant 0 : i32
    %c0_i32_0 = arith.constant 0 : i32
    %c0_i32_1 = arith.constant 0 : i32
    return %c0_i32, %c0_i32_0 : i32, i32
  }
  func.func @transform_14(%arg0: i32, %arg1: memref<2xi32, #tpu.memory_space<smem>>) -> (i32, i32) {
    %c0_i32 = arith.constant 0 : i32
    %c0_i32_0 = arith.constant 0 : i32
    %c0_i32_1 = arith.constant 0 : i32
    return %c0_i32, %c0_i32_0 : i32, i32
  }
  func.func @transform_15(%arg0: i32, %arg1: memref<2xi32, #tpu.memory_space<smem>>) -> (i32, i32) {
    %c0_i32 = arith.constant 0 : i32
    %c0_i32_0 = arith.constant 0 : i32
    %c0_i32_1 = arith.constant 0 : i32
    return %c0_i32, %c0_i32_0 : i32, i32
  }
  func.func @transform_16(%arg0: i32, %arg1: memref<2xi32, #tpu.memory_space<smem>>) -> (i32, i32) {
    %c0_i32 = arith.constant 0 : i32
    %c0_i32_0 = arith.constant 0 : i32
    %c0_i32_1 = arith.constant 0 : i32
    return %c0_i32, %c0_i32_0 : i32, i32
  }
  func.func @transform_17(%arg0: i32, %arg1: memref<2xi32, #tpu.memory_space<smem>>) -> (i32, i32) {
    %c0_i32 = arith.constant 0 : i32
    %c0_i32_0 = arith.constant 0 : i32
    %c0_i32_1 = arith.constant 0 : i32
    return %c0_i32, %c0_i32_0 : i32, i32
  }
  func.func @transform_18(%arg0: i32, %arg1: memref<2xi32, #tpu.memory_space<smem>>) -> (i32, i32) {
    %c0_i32 = arith.constant 0 : i32
    %c0_i32_0 = arith.constant 0 : i32
    %c0_i32_1 = arith.constant 0 : i32
    return %c0_i32, %c0_i32_0 : i32, i32
  }
  func.func @transform_19(%arg0: i32, %arg1: memref<2xi32, #tpu.memory_space<smem>>) -> (i32, i32) {
    %c0_i32 = arith.constant 0 : i32
    %c0_i32_0 = arith.constant 0 : i32
    %c0_i32_1 = arith.constant 0 : i32
    return %c0_i32, %c0_i32_0 : i32, i32
  }
  func.func @transform_20(%arg0: i32, %arg1: memref<2xi32, #tpu.memory_space<smem>>) -> (i32, i32, i32) {
    %c0_i32 = arith.constant 0 : i32
    %c0_i32_0 = arith.constant 0 : i32
    %c0_i32_1 = arith.constant 0 : i32
    return %arg0, %c0_i32, %c0_i32_0 : i32, i32, i32
  }
}

</mosaic_0001>

<bundles_post_ra>
// kernel: tpu_custom_call.1
= control target key start
LH: loop header
LB: loop body
LE: loop exit
PB: predicated region body
PF: predicated region fallthrough
CT: control target
= control target key end

     0   :  { %s3554_s0 = inlined_call_operand.vmem [shape: s32[2], index: 0, kind: input, shape index: {}]   ;;  %s3555_s1 = inlined_call_operand.vmem [shape: f32[2,8,12], index: 1, kind: input, shape index: {}]   ;;  %s3556_s2 = inlined_call_operand.vmem [shape: bf16[12,32], index: 2, kind: input, shape index: {}]   ;;  %s3557_s3 = inlined_call_operand.vmem [shape: f32[1,32], index: 3, kind: input, shape index: {}]   ;;  %s3558_s4 = inlined_call_operand.vmem [shape: f32[8,32], index: 4, kind: input, shape index: {}]   ;;  %s3559_s5 = inlined_call_operand.vmem [shape: bf16[4,32,8], index: 5, kind: input, shape index: {}]   ;;  %s3560_s6 = inlined_call_operand.vmem [shape: bf16[4,32,8], index: 6, kind: input, shape index: {}]   ;;  %s3561_s7 = inlined_call_operand.vmem [shape: bf16[4,32,8], index: 7, kind: input, shape index: {}]   ;;  %s3562_s8 = inlined_call_operand.vmem [shape: bf16[4,8,32], index: 8, kind: input, shape index: {}]   ;;  %s3563_s9 = inlined_call_operand.vmem [shape: f32[4,1,8], index: 9, kind: input, shape index: {}]   ;;  %s3564_s10 = inlined_call_operand.vmem [shape: f32[4,1,8], index: 10, kind: input, shape index: {}]   ;;  %s3565_s11 = inlined_call_operand.vmem [shape: f32[4,1,8], index: 11, kind: input, shape index: {}]   ;;  %s3566_s12 = inlined_call_operand.vmem [shape: f32[1,32], index: 12, kind: input, shape index: {}]   ;;  %s3567_s13 = inlined_call_operand.vmem [shape: f32[1,32], index: 13, kind: input, shape index: {}]   ;;  %s3568_s14 = inlined_call_operand.vmem [shape: f32[1,32], index: 14, kind: input, shape index: {}]   ;;  %s3569_s15 = inlined_call_operand.vmem [shape: bf16[32,64], index: 15, kind: input, shape index: {}]   ;;  %s3570_s16 = inlined_call_operand.vmem [shape: f32[1,64], index: 16, kind: input, shape index: {}]   ;;  %s3571_s17 = inlined_call_operand.vmem [shape: bf16[64,32], index: 17, kind: input, shape index: {}]   ;;  %s3572_s18 = inlined_call_operand.vmem [shape: f32[1,32], index: 18, kind: input, shape index: {}]   ;;  %s3573_s19 = inlined_call_operand.vmem [shape: f32[1,32], index: 19, kind: input, shape index: {}]   ;;  %s3574_s20 = inlined_call_operand.vmem [shape: f32[1,32], index: 20, kind: input, shape index: {}]   ;;  %s3575_s21 = inlined_call_operand.hbm [shape: bf16[2,8,32], index: 21, kind: output, shape index: {}]  }
   0x1   :  { %3583 = sst [smem:[#allocation13_spill]] %s3554_s0 }
   0x2   :  { %3584 = sst [smem:[#allocation14_spill]] %s3555_s1  ;;  %s3590_s26 = sld [smem:[#allocation13_spill]] }
   0x3   :  { %3585 = sst [smem:[#allocation15_spill]] %s3556_s2 }
   0x4   :  { %3586 = sst [smem:[#allocation16_spill]] %s3557_s3 }
   0x5   :  { %3587 = sst [smem:[#allocation17_spill]] %s3558_s4 }
   0x6   :  { %3588 = sst [smem:[#allocation18_spill]] %s3559_s5 }
   0x7   :  { %3589 = sst [smem:[#allocation19_spill]] %s3568_s14 }
   0x8   :  { %s26_s14 = sshll.u32 %s3590_s26, 4  ;;  %s27_s14 = int_to_ptr.vmem [resolvable:$true] %s26_s14 }
   0x9   :  { %s2910_s27 = scalar_lea.vmem %s27_s14, 16  ;;  %p2915_p1 = scmp.lt.s32.totalorder %s27_s14, %s27_s14 }
   0xa   :  { %p2911_p0 = scmp.ne.s32.totalorder %s27_s14, %s2910_s27  ;;  %p2916_p2 = scmp.lt.s32.totalorder %s2910_s27, %s2910_s27 }
   0xc   :  { %p2917_p3 = por %p2916_p2, %p2915_p1 }
   0xe   :  { %p2918_p4 = pnand %p2917_p3, %p2911_p0 }
  0x10   :  { %2921 = shalt.err (!%p2918_p4)  }
  0x11   :  { %s2988_s3 = smov [#allocation3]  }
  0x12   :  { %29 = dma.vmem_to_smem %s27_s14, 16, %s2988_s3, [#allocation2] }
  0x13   :  { %2966 = dma.done.wait [#allocation2], 16 }
  0x14   :  { %2967 = vsyncadd [#allocation2], 4294967280 }
  0x15   :  { %31 = sfence }
  0x16   :  { %32 = vsyncpa [#allocation5], 0 }
  0x17   :  { %34 = vsyncpa [#allocation5 + $0x1], 0  ;;  %s3105_s28 = smov 0   ;;  %s3107_s29 = smov 0  }
  0x18   :  { %s3109_s0 = smov 0   ;;  %s3111_s4 = smov 0  }
  0x19 LB: > { %3591 = sst [smem:[#allocation8_spill]] %s2974_s28  ;;  %s3126_s14 = sadd.s32 4294967295, %s2986_s4   ;;  %s2986_s4 = sphi %s3111_s4, %s3609_s4   ;;  %s2982_s0 = sphi %s3109_s0, %s3611_s0   ;;  %s2978_s29 = sphi %s3107_s29, %s3613_s29   ;;  %s2974_s28 = sphi %s3105_s28, %s3612_s28  }
  0x1a   : > { %3592 = sst [smem:[#allocation9_spill]] %s2982_s0  ;;  %s2417_s30 = sadd.s32 4294967294, %s2986_s4  }
  0x1b   : > { %s3130_s5 = sadd.s32 1, %s2986_s4   ;;  %s472_s22 = sadd.s32 1, %s2982_s0 }
  0x1c   : > { %3593 = sst [smem:[#allocation10_spill]] %s3130_s5  ;;  %s469_s23 = ssub.s32 %s2986_s4, %s3130_s5 }
  0x1d   : > { %p482_p5 = scmp.ne.s32.totalorder %s2982_s0, %s2978_s29  ;;  %p470_p6 = scmp.eq.s32.totalorder %s469_s23, 0 }
  0x1e   : > { %p483_p7 = scmp.eq.s32.totalorder %s3126_s14, 1  ;;  %p488_p8 = scmp.ne.s32.totalorder %s2978_s29, %s2974_s28 }
  0x1f   : > { %p489_p9 = scmp.eq.s32.totalorder %s2417_s30, 1  ;;  %p2420_p12 = scmp.ge.s32.totalorder %s2986_s4, 1 }
  0x20   : > { %s3141_s1 = scalar_select %p470_p6, %s2982_s0, %s472_s22  }
  0x21   : > { %p3143_p10 = por %p483_p7, %p482_p5  ;;  %p3147_p11 = por %p489_p9, %p488_p8 }
  0x22   : > { %3594 = sst [smem:[#allocation11_spill]] %s3141_s1  ;;  %p571_p13 = scmp.lt.s32.totalorder %s2986_s4, 3 }
  0x23   : > { %s3596_s2 = scalar_select %p3147_p11, 1, 0 }
  0x24   : > { %p572_p0 = pnand %p2420_p12, %p571_p13 }
  0x25   : > { %3597 = sst [smem:[#allocation12_spill]] %s3596_s2  ;;  %vm653_vm0 = vcmask (!%p572_p0), 1045504   ;;  %v2989_v0 = vmov (!%p572_p0), 0.0   ;;  %s3598_s27 = sld [smem:[#allocation15_spill]] (!%p572_p0)  ;;  %vm2990_vm1 = vmmov (!%p572_p0), 0   ;;  %vm649_vm2 = vcmask (!%p572_p0), 97280  }
  0x26   : > { %575 = sbr.rel (%p572_p0) target bundleno = 5238 (0x1476), region = 100  ;;  %2623 = vmatprep.subr.bf16.mxu1 (!%p572_p0), %v2989_v0  ;;  %p628_p1 = scmp.lt.s32.totalorder (!%p572_p0), %s3126_s14, 1  ;;  %2637 = vmatprep.subr.bf16.mxu0 (!%p572_p0), %v2989_v0  ;;  %v2861_v6 = vld [vmem:[%s3560_s6] sm:$0xff] (!%p572_p0)   ;;  %v2863_v8 = vld [vmem:[%s3560_s6 + $0x8] sm:$0xff] (!%p572_p0)   ;;  %vm728_vm3 = vcmask (!%p572_p0), 261120   ;;  %vm902_vm4 = vcmask (!%p572_p0), 64512   ;;  %v701_v48 = vlaneseq (!%p572_p0) }
  0x27   : > { %2625 = vmatprep.mubr.msk.bf16.mxu1 (!%p572_p0), %vm2990_vm1, %v2989_v0  ;;  %2641 = vmatprep.mubr.msk.bf16.mxu0 (!%p572_p0), %vm2990_vm1, %v2989_v0  ;;  %s3599_s25 = sld [smem:[#allocation14_spill]] (!%p572_p0)  ;;  %s3600_s0 = sld [smem:[#allocation18_spill]] (!%p572_p0)  ;;  %v2864_v17 = vld [vmem:[%s3561_s7] sm:$0xff] (!%p572_p0)   ;;  %v2865_v19 = vld [vmem:[%s3561_s7 + $0x8] sm:$0xff] (!%p572_p0)   ;;  %vm967_vm5 = vcmask (!%p572_p0), 1043456   ;;  %v2868_v46 = vld [vmem:[%s3561_s7 + $0x10] sm:$0xff] (!%p572_p0)  }
  0x28   : > { %2638 = vmatpush3.bf16.msra.mxu0 (!%p572_p0), %v2861_v6  ;;  %s3602_s1 = sld [smem:[#allocation16_spill]] (!%p572_p0)  ;;  %v2430_v20 = vld [vmem:[%s3564_s10] ss:$0 sm:$0xff] (!%p572_p0)  ;;  %v2869_v47 = vld [vmem:[%s3561_s7 + $0x18] sm:$0xff] (!%p572_p0)   ;;  %v702_v49 = vand.u32 (!%p572_p0), 127, %v701_v48  ;;  %vm2267_vm7 = vcmask (!%p572_p0), 523264  }
  0x29   : > { %2639 = vmatprep.subr.bf16.mxu0 (!%p572_p0), %v2989_v0  ;;  %v2426_v21 = vld [vmem:[%s3563_s9] ss:$0 sm:$0xff] (!%p572_p0)  ;;  %v2463_v62 = vld [vmem:[%s3565_s11 + $0x1] ss:$0 sm:$0xff] (!%p572_p0)  ;;  %s625_s2 = sand.u32 (!%p572_p0), 1, %s2978_s29   ;;  %s2550_s22 = sshll.u32 (!%p572_p0), %s3126_s14, 6 }
  0x2a   : > { %v2434_v34 = vld [vmem:[%s3565_s11] ss:$0 sm:$0xff] (!%p572_p0)  ;;  %vm2342_vm8 = vcmask (!%p572_p0), 257024  }
  0x2b   : > { %v2859_v1 = vld [vmem:[%s3598_s27] sm:$0x3f] (!%p572_p0)  }
  0x2c   : > { %v655_v2 = vsel (!%p572_p0), %vm653_vm0, %v2859_v1, 0  ;;  %2640 = vmatpush3.bf16.msra.mxu0 (!%p572_p0), %v2863_v8 }
  0x2d   : > { %s629_s3 = scalar_select %p628_p1, %s3126_s14, 1  ;;  %2624 = vmatpush3.bf16.msra.mxu1 %v655_v2  ;;  %v2860_v5 = vld [vmem:[%s3600_s0] sm:$0xff]   ;;  %2653 = vmatprep.subr.bf16.mxu0 %v2989_v0 }
  0x2e   : > { %2629 = vmatprep.subr.bf16.mxu1 %v2989_v0  ;;  %s3601_s5 = smov %s3600_s0  ;;  %v2423_v9 = vld [vmem:[%s3602_s1] ss:$0 sm:$0xff]  ;;  %s700_s1 = sld [smem:[#allocation3 + %s3126_s14]] }
  0x2f   : > { %s2422_s30 = sshll.u32 %s629_s3, 3  ;;  %v2862_v7 = vld [vmem:[%s3601_s5 + $0x8] sm:$0xff]   ;;  %v2866_v40 = vld [vmem:[%s3601_s5 + $0x10] sm:$0xff]   ;;  %v2867_v45 = vld [vmem:[%s3601_s5 + $0x18] sm:$0xff]   ;;  %s2991_s14 = smov [#allocation4]  }
  0x30   : > { %s631_s26 = scalar_lea.vmem %s3599_s25, %s2422_s30  ;;  %s2421_s25 = sshll.u32 %s625_s2, 2 }
  0x31   : > { %v633_v3 = vld [vmem:[%s631_s26] sm:$0xff]  ;;  %s3603_s26 = sld [smem:[#allocation17_spill]]  ;;  %s627_s23 = scalar_lea.vmem [#allocation4], %s2421_s25 }
  0x32   : > { %v634_v4 = vpack.c.bf16 %v633_v3, %v633_v3  ;;  %s2358_s28 = sshll.u32 %s627_s23, 4  ;;  %s2926_s25 = sshll.u32 %s2991_s14, 4  ;;  %s3514_s28 = int_to_ptr.vmem [resolvable:$true] %s2358_s28  ;;  %s2927_s25 = int_to_ptr.vmem [resolvable:$false] %s2926_s25 }
  0x33   : > { %s2922_s27 = scalar_lea.vmem %s3514_s28, 64  ;;  %s2928_s3 = scalar_lea.vmem %s2927_s25, 128 }
  0x34   : > { %2626 = vmatmul.mubr.msk.bf16.vlgmr.msra.gmra.mrb[0].mxu1 %vm649_vm2, %v634_v4  ;;  %v703_v50 = vstv %s700_s1  ;;  %p2923_p2 = scmp.ne.s32.totalorder %s3514_s28, %s2922_s27  ;;  %p2929_p5 = scmp.lt.s32.totalorder %s3514_s28, %s2927_s25 }
  0x35   : > { %2633 = vmatprep.mubr.msk.bf16.mxu1 %vm2990_vm1, %v2989_v0  ;;  %2630 = vmatpush3.bf16.msra.mxu1 %v2860_v5  ;;  %vm3259_vm6 = vcmp.lt.s32.totalorder %v702_v49, %v703_v50  ;;  %p2930_p6 = scmp.lt.s32.totalorder %s2928_s3, %s2922_s27 }
  0x36   : > { %2631 = vmatprep.subr.bf16.mxu1 %v2989_v0  ;;  %p2924_p3 = pnand %p2923_p2, %p3143_p10 }
  0x37   : > { %v697_v11 = vld [vmem:[%s3603_s26] sm:$0xff]  ;;  %s3606_s26 = sld [smem:[#allocation19_spill]]  ;;  %p2931_p7 = por %p2930_p6, %p2929_p5 }
  0x38   : > { %p2925_p4 = pneg %p2924_p3 }
  0x39   : > { %2632 = vmatpush3.bf16.msra.mxu1 %v2862_v7 }
  0x3a   : > { %2645 = vmatprep.subr.bf16.mxu1 %v2989_v0  ;;  %p2932_p8 = pnand %p2931_p7, %p2925_p4 }
 0x107   : > { %v691_v10 = vpop.f32.mrb[0].mxu1 }
 0x108   : > { %v692_v12 = vadd.f32 %v2423_v9, %v691_v10  ;;  %v2627_v13 = vpop.f32.mrb[1].mxu1 }
 0x109   : > { %v694_v14 = vpop.f32.mrb[2].mxu1 }
 0x10a   : > { %v3192_v15 = vadd.f32 %v697_v11, %v692_v12  ;;  %v2628_v16 = vpop.f32.mrb[3].mxu1 }
 0x10b   : > { %v2870_v16 = vld [vmem:[%s3560_s6 + $0x10] sm:$0xff]  }
 0x10c   : > { %v3199_v18 = vpack.c.bf16 %v3192_v15, %v3192_v15 }
 0x10e   : > { %2634 = vmatmul.mubr.msk.bf16.vlgmr.msra.gmra.mrb[4].mxu1 %vm728_vm3, %v3199_v18  ;;  %2642 = vmatmul.mubr.msk.bf16.vlgmr.msra.gmra.mrb[0].mxu0 %vm728_vm3, %v3199_v18 }
 0x10f   : > { %2646 = vmatpush3.bf16.msra.mxu1 %v2864_v17  ;;  %2649 = vmatprep.mubr.msk.bf16.mxu1 %vm2990_vm1, %v2989_v0 }
 0x110   : > { %2647 = vmatprep.subr.bf16.mxu1 %v2989_v0  ;;  %2655 = vmatprep.mubr.msk.bf16.mxu0 %vm2990_vm1, %v2989_v0 }
 0x113   : > { %2648 = vmatpush3.bf16.msra.mxu1 %v2865_v19  ;;  %v2871_v19 = vld [vmem:[%s3560_s6 + $0x18] sm:$0xff]  }
 0x114   : > { %2659 = vmatprep.subr.bf16.mxu1 %v2989_v0 }
 0x116   : > { %2650 = vmatmul.mubr.msk.bf16.vlgmr.msra.gmra.mrb[8].mxu1 %vm728_vm3, %v3199_v18 }
 0x117   : > { %2661 = vmatprep.mubr.msk.bf16.mxu1 %vm2990_vm1, %v2989_v0 }
 0x1e1   : > { %v766_v22 = vpop.f32.mrb[4].mxu1  ;;  %v830_v23 = vpop.f32.mrb[0].mxu0 }
 0x1e2   : > { %v831_v24 = vadd.f32 %v2430_v20, %v830_v23  ;;  %v2635_v25 = vpop.f32.mrb[5].mxu1  ;;  %v2643_v26 = vpop.f32.mrb[1].mxu0  ;;  %v767_v29 = vadd.f32 %v2426_v21, %v766_v22 }
 0x1e3   : > { %v769_v27 = vpop.f32.mrb[6].mxu1  ;;  %v833_v28 = vpop.f32.mrb[2].mxu0  ;;  %v2445_v25 = vld [vmem:[%s3563_s9 + $0x1] ss:$0 sm:$0xff] }
 0x1e4   : > { %v900_v30 = vpack.c.bf16 %v831_v24, %v831_v24  ;;  %v2636_v31 = vpop.f32.mrb[7].mxu1  ;;  %v2644_v32 = vpop.f32.mrb[3].mxu0  ;;  %v772_v35 = vmul.f32 0.35355338, %v767_v29  ;;  %v2454_v24 = vld [vmem:[%s3564_s10 + $0x1] ss:$0 sm:$0xff] }
 0x1e6   : > { %v907_v33 = vsel %vm902_vm4, %v900_v30, 0  ;;  %v899_v41 = vpack.c.bf16 %v772_v35, %v772_v35 }
 0x1e7   : > { %2654 = vmatpush3.bf16.xpose.msra.mxu0 %v907_v33 }
 0x1e8   : > { %2665 = vmatprep.subr.bf16.mxu0 %v2989_v0 }
 0x1e9   : > { %v893_v36 = vpop.f32.mrb[8].mxu1 }
 0x1ea   : > { %v894_v37 = vadd.f32 %v2434_v34, %v893_v36  ;;  %v2651_v38 = vpop.f32.mrb[9].mxu1 }
 0x1eb   : > { %v896_v39 = vpop.f32.mrb[10].mxu1 }
 0x1ec   : > { %v901_v42 = vpack.c.bf16 %v894_v37, %v894_v37  ;;  %v2652_v43 = vpop.f32.mrb[11].mxu1 }
 0x1ee   : > { %v969_v44 = vsel %vm967_vm5, %v901_v42, 0  ;;  %2656 = vmatmul.mubr.msk.bf16.vlgmr.msra.gmra.mrb[4].mxu0 %vm902_vm4, %v899_v41 }
 0x1ef   : > { %2660 = vmatpush3.bf16.msra.mxu1 %v969_v44  ;;  %2666 = vmatpush3.bf16.msra.mxu0 %v2866_v40 }
 0x1f0   : > { %2667 = vmatprep.subr.bf16.mxu0 %v2989_v0  ;;  %2669 = vmatprep.mubr.msk.bf16.mxu0 %vm2990_vm1, %v2989_v0 }
 0x1f1   : > { %2673 = vmatprep.subr.bf16.mxu1 %v2989_v0 }
 0x1f3   : > { %2668 = vmatpush3.bf16.msra.mxu0 %v2867_v45 }
 0x1f4   : > { %2681 = vmatprep.subr.bf16.mxu0 %v2989_v0 }
 0x1f6   : > { %2670 = vmatmul.mubr.msk.bf16.vlgmr.msra.gmra.mrb[8].mxu0 %vm728_vm3, %v3199_v18 }
 0x1f7   : > { %2682 = vmatpush3.bf16.msra.mxu0 %v2868_v46  ;;  %2685 = vmatprep.mubr.msk.bf16.mxu0 %vm2990_vm1, %v2989_v0 }
 0x1f8   : > { %2683 = vmatprep.subr.bf16.mxu0 %v2989_v0 }
 0x1fb   : > { %2684 = vmatpush3.bf16.msra.mxu0 %v2869_v47  ;;  %v2469_v47 = vld [vmem:[%s3562_s8 + $0x4] sm:$0xf] }
 0x1fc   : > { %2695 = vmatprep.subr.bf16.mxu0 %v2989_v0  ;;  %v1324_v48 = vsel %vm967_vm5, %v2469_v47, 0 }
 0x1fe   : > { %2686 = vmatmul.mubr.msk.bf16.vlgmr.msra.gmra.mrb[12].mxu0 %vm728_vm3, %v3199_v18 }
 0x1ff   : > { %2697 = vmatprep.mubr.msk.bf16.mxu0 %vm2990_vm1, %v2989_v0 }
 0x2c1   : > { %v943_v52 = vpop.f32.mrb[4].mxu0 }
 0x2c2   : > { %v951_v53 = vsel %vm3259_vm6, %v943_v52, -1e+30  ;;  %v2657_v54 = vpop.f32.mrb[5].mxu0  ;;  %v1012_v52 = vld [vmem:[%s3562_s8] sm:$0xf] }
 0x2c3   : > { %v946_v55 = vpop.f32.mrb[6].mxu0  ;;  %v952_v56 = vsel %vm902_vm4, %v951_v53, -inf }
 0x2c4   : > { %953 = vmax.xlane.f32.xlu0 %v952_v56  ;;  %v2658_v57 = vpop.f32.mrb[7].mxu0  ;;  %v1370_v55 = vsel %vm967_vm5, %v1012_v52, 0  ;;  %v2872_v56 = vld [vmem:[%s3560_s6 + $0x20] sm:$0xff]   ;;  %v2501_v52 = vld [vmem:[%s3562_s8 + $0x8] sm:$0xf] }
 0x2c9   : > { %v1072_v58 = vpop.f32.mrb[8].mxu0 }
 0x2ca   : > { %v2671_v59 = vpop.f32.mrb[9].mxu0  ;;  %v1073_v30 = vadd.f32 %v2445_v25, %v1072_v58  ;;  %v2873_v58 = vld [vmem:[%s3560_s6 + $0x28] sm:$0xff]  }
 0x2cb   : > { %v1075_v60 = vpop.f32.mrb[10].mxu0 }
 0x2cc   : > { %v2672_v61 = vpop.f32.mrb[11].mxu0  ;;  %v1078_v34 = vmul.f32 0.35355338, %v1073_v30  ;;  %v2874_v60 = vld [vmem:[%s3601_s5 + $0x20] sm:$0xff]  }
 0x2ce   : > { %v1209_v35 = vpack.c.bf16 %v1078_v34, %v1078_v34 }
 0x2d1   : > { %v1203_v63 = vpop.f32.mrb[12].mxu0 }
 0x2d2   : > { %v1204_v1 = vadd.f32 %v2463_v62, %v1203_v63  ;;  %v2687_v2 = vpop.f32.mrb[13].mxu0 }
 0x2d3   : > { %v1206_v3 = vpop.f32.mrb[14].mxu0  ;;  %v2875_v2 = vld [vmem:[%s3601_s5 + $0x28] sm:$0xff]  }
 0x2d4   : > { %v1211_v4 = vpack.c.bf16 %v1204_v1, %v1204_v1  ;;  %v2688_v5 = vpop.f32.mrb[15].mxu0 }
 0x2d6   : > { %v1275_v6 = vsel %vm967_vm5, %v1211_v4, 0  ;;  %v2876_v4 = vld [vmem:[%s3561_s7 + $0x20] sm:$0xff]  }
 0x2d7   : > { %2696 = vmatpush3.bf16.msra.mxu0 %v1275_v6 }
 0x2d8   : > { %2707 = vmatprep.subr.bf16.mxu0 %v2989_v0 }
 0x351   : > { %v954_v7 = vpop.xlane.xlu0 %953 }
 0x352   : > { %v955_v8 = vsub.f32 %v951_v53, %v954_v7 }
 0x354   : > { %v956_v9 = vmul.f32 1.442695, %v955_v8  ;;  %v2877_v8 = vld [vmem:[%s3561_s7 + $0x28] sm:$0xff]  }
 0x356   : > { %2890 = vpow2.f32 %v956_v9  ;;  %v2486_v9 = vld [vmem:[%s3564_s10 + $0x2] ss:$0 sm:$0xff] }
 0x360   : > { %v2891_v10 = vpop.eup %2890 }
 0x361   : > { %v958_v11 = vsel %vm902_vm4, %v2891_v10, 0.0 }
 0x362   : > { %959 = vadd.xlane.f32.xlu0 %v958_v11 }
 0x3ef   : > { %v960_v12 = vpop.xlane.xlu0 %959 }
 0x3f0   : > { %2892 = vrcp.f32 %v960_v12 }
 0x3fa   : > { %v2893_v13 = vpop.eup %2892 }
 0x3fb   : > { %v962_v14 = vmul.f32 %v2893_v13, %v2891_v10 }
 0x3fd   : > { %v963_v17 = vpack.c.bf16 %v962_v14, %v962_v14 }
 0x3ff   : > { %2662 = vmatmul.mubr.msk.bf16.vlgmr.msra.gmra.mrb[12].mxu1 %vm902_vm4, %v963_v17 }
 0x400   : > { %2674 = vmatpush3.bf16.msra.mxu1 %v2870_v16  ;;  %2677 = vmatprep.mubr.msk.bf16.mxu1 %vm2990_vm1, %v2989_v0 }
 0x401   : > { %2675 = vmatprep.subr.bf16.mxu1 %v2989_v0 }
 0x404   : > { %2676 = vmatpush3.bf16.msra.mxu1 %v2871_v19 }
 0x405   : > { %2689 = vmatprep.subr.bf16.mxu1 %v2989_v0 }
 0x407   : > { %2678 = vmatmul.mubr.msk.bf16.vlgmr.msra.gmra.mrb[16].mxu1 %vm728_vm3, %v3199_v18 }
 0x408   : > { %2691 = vmatprep.mubr.msk.bf16.mxu1 %vm2990_vm1, %v2989_v0 }
 0x4d2   : > { %v1005_v20 = vpop.f32.mrb[12].mxu1 }
 0x4d3   : > { %v2663_v21 = vpop.f32.mrb[13].mxu1  ;;  %v1011_v57 = vpack.c.bf16 %v1005_v20, %v1005_v20 }
 0x4d4   : > { %v1008_v22 = vpop.f32.mrb[14].mxu1 }
 0x4d5   : > { %v2664_v23 = vpop.f32.mrb[15].mxu1 }
 0x4da   : > { %v1138_v26 = vpop.f32.mrb[16].mxu1 }
 0x4db   : > { %v1139_v27 = vadd.f32 %v2454_v24, %v1138_v26  ;;  %v2679_v28 = vpop.f32.mrb[17].mxu1  ;;  %v2477_v24 = vld [vmem:[%s3563_s9 + $0x2] ss:$0 sm:$0xff] }
 0x4dc   : > { %v1141_v29 = vpop.f32.mrb[18].mxu1 }
 0x4dd   : > { %v1210_v31 = vpack.c.bf16 %v1139_v27, %v1139_v27  ;;  %v2680_v32 = vpop.f32.mrb[19].mxu1 }
 0x4de   : > { %v2495_v32 = vld [vmem:[%s3565_s11 + $0x2] ss:$0 sm:$0xff] }
 0x4df   : > { %v1216_v33 = vsel %vm902_vm4, %v1210_v31, 0 }
 0x4e0   : > { %2690 = vmatpush3.bf16.xpose.msra.mxu1 %v1216_v33 }
 0x4e1   : > { %2701 = vmatprep.subr.bf16.mxu1 %v2989_v0 }
 0x4e7   : > { %2692 = vmatmul.mubr.msk.bf16.vlgmr.msra.gmra.mrb[20].mxu1 %vm902_vm4, %v1209_v35 }
 0x4e8   : > { %2703 = vmatprep.mubr.msk.bf16.mxu1 %vm2990_vm1, %v2989_v0  ;;  %2702 = vmatpush3.bf16.msra.mxu1 %v1324_v48 }
 0x4e9   : > { %2713 = vmatprep.subr.bf16.mxu1 %v2989_v0 }
 0x5ba   : > { %v1252_v36 = vpop.f32.mrb[20].mxu1 }
 0x5bb   : > { %v1258_v37 = vsel %vm3259_vm6, %v1252_v36, -1e+30  ;;  %v2693_v38 = vpop.f32.mrb[21].mxu1 }
 0x5bc   : > { %v1255_v39 = vpop.f32.mrb[22].mxu1  ;;  %v1259_v40 = vsel %vm902_vm4, %v1258_v37, -inf }
 0x5bd   : > { %1260 = vmax.xlane.f32.xlu1 %v1259_v40  ;;  %v2694_v41 = vpop.f32.mrb[23].mxu1 }
 0x64a   : > { %v1261_v42 = vpop.xlane.xlu1 %1260 }
 0x64b   : > { %v1262_v43 = vsub.f32 %v1258_v37, %v1261_v42 }
 0x64d   : > { %v1263_v44 = vmul.f32 1.442695, %v1262_v43 }
 0x64f   : > { %2894 = vpow2.f32 %v1263_v44 }
 0x659   : > { %v2895_v45 = vpop.eup %2894 }
 0x65a   : > { %v1265_v46 = vsel %vm902_vm4, %v2895_v45, 0.0 }
 0x65b   : > { %1266 = vadd.xlane.f32.xlu1 %v1265_v46 }
 0x6e8   : > { %v1267_v49 = vpop.xlane.xlu1 %1266 }
 0x6e9   : > { %2896 = vrcp.f32 %v1267_v49 }
 0x6f3   : > { %v2897_v50 = vpop.eup %2896 }
 0x6f4   : > { %v1269_v53 = vmul.f32 %v2897_v50, %v2895_v45 }
 0x6f6   : > { %v1270_v54 = vpack.c.bf16 %v1269_v53, %v1269_v53  ;;  %v1723_v53 = vsel %vm967_vm5, %v2501_v52, 0 }
 0x6f8   : > { %2698 = vmatmul.mubr.msk.bf16.vlgmr.msra.gmra.mrb[16].mxu0 %vm902_vm4, %v1270_v54 }
 0x6f9   : > { %2708 = vmatpush3.bf16.msra.mxu0 %v1370_v55  ;;  %2709 = vmatprep.mubr.msk.bf16.mxu0 %vm2990_vm1, %v2989_v0 }
 0x6fa   : > { %2721 = vmatprep.subr.bf16.mxu0 %v2989_v0 }
 0x700   : > { %2710 = vmatmul.mubr.msk.bf16.vlgmr.msra.gmra.mrb[20].mxu0 %vm902_vm4, %v1011_v57  ;;  %v2878_v57 = vld [vmem:[%s3601_s5 + $0x30] sm:$0xff]  }
 0x701   : > { %2722 = vmatpush3.bf16.msra.mxu0 %v2872_v56  ;;  %2725 = vmatprep.mubr.msk.bf16.mxu0 %vm2990_vm1, %v2989_v0 }
 0x702   : > { %2723 = vmatprep.subr.bf16.mxu0 %v2989_v0 }
 0x705   : > { %2724 = vmatpush3.bf16.msra.mxu0 %v2873_v58 }
 0x706   : > { %2737 = vmatprep.subr.bf16.mxu0 %v2989_v0 }
 0x708   : > { %2726 = vmatmul.mubr.msk.bf16.vlgmr.msra.gmra.mrb[24].mxu0 %vm728_vm3, %v3199_v18 }
 0x709   : > { %2739 = vmatprep.mubr.msk.bf16.mxu0 %vm2990_vm1, %v2989_v0 }
 0x7cb   : > { %v1311_v59 = vpop.f32.mrb[16].mxu0 }
 0x7cc   : > { %v1317_v61 = vpack.c.bf16 %v1311_v59, %v1311_v59  ;;  %v2699_v62 = vpop.f32.mrb[17].mxu0  ;;  %v2879_v59 = vld [vmem:[%s3601_s5 + $0x38] sm:$0xff]   ;;  %s3512_s5 = scalar_lea.hbm %s3575_s21, %s2550_s22 }
 0x7cd   : > { %v1314_v63 = vpop.f32.mrb[18].mxu0 }
 0x7ce   : > { %v2700_v1 = vpop.f32.mrb[19].mxu0  ;;  %2704 = vmatmul.mubr.msk.bf16.vlgmr.msra.gmra.mrb[24].mxu1 %vm902_vm4, %v1317_v61  ;;  %v2881_v61 = vld [vmem:[%s3561_s7 + $0x38] sm:$0xff]   ;;  %v2882_v63 = vld [vmem:[%s3560_s6 + $0x30] sm:$0xff]  }
 0x7cf   : > { %2714 = vmatpush3.bf16.msra.mxu1 %v2874_v60  ;;  %2717 = vmatprep.mubr.msk.bf16.mxu1 %vm2990_vm1, %v2989_v0  ;;  %v2880_v60 = vld [vmem:[%s3561_s7 + $0x30] sm:$0xff]  }
 0x7d0   : > { %2715 = vmatprep.subr.bf16.mxu1 %v2989_v0 }
 0x7d3   : > { %v1406_v3 = vpop.f32.mrb[20].mxu0  ;;  %2716 = vmatpush3.bf16.msra.mxu1 %v2875_v2 }
 0x7d4   : > { %v2711_v5 = vpop.f32.mrb[21].mxu0  ;;  %2729 = vmatprep.subr.bf16.mxu1 %v2989_v0 }
 0x7d5   : > { %v1409_v6 = vpop.f32.mrb[22].mxu0  ;;  %v2883_v5 = vld [vmem:[%s3560_s6 + $0x38] sm:$0xff]  }
 0x7d6   : > { %v2712_v7 = vpop.f32.mrb[23].mxu0  ;;  %2718 = vmatmul.mubr.msk.bf16.vlgmr.msra.gmra.mrb[28].mxu1 %vm728_vm3, %v3199_v18 }
 0x7d7   : > { %2730 = vmatpush3.bf16.msra.mxu1 %v2876_v4  ;;  %2733 = vmatprep.mubr.msk.bf16.mxu1 %vm2990_vm1, %v2989_v0 }
 0x7d8   : > { %2731 = vmatprep.subr.bf16.mxu1 %v2989_v0 }
 0x7db   : > { %v1537_v10 = vpop.f32.mrb[24].mxu0  ;;  %2732 = vmatpush3.bf16.msra.mxu1 %v2877_v8 }
 0x7dc   : > { %v1538_v11 = vadd.f32 %v2486_v9, %v1537_v10  ;;  %v2727_v12 = vpop.f32.mrb[25].mxu0  ;;  %2743 = vmatprep.subr.bf16.mxu1 %v2989_v0  ;;  %v2526_v10 = vld [vmem:[%s3565_s11 + $0x3] ss:$0 sm:$0xff] }
 0x7dd   : > { %v1540_v13 = vpop.f32.mrb[26].mxu0 }
 0x7de   : > { %v1609_v14 = vpack.c.bf16 %v1538_v11, %v1538_v11  ;;  %v2728_v16 = vpop.f32.mrb[27].mxu0  ;;  %2734 = vmatmul.mubr.msk.bf16.vlgmr.msra.gmra.mrb[32].mxu1 %vm728_vm3, %v3199_v18 }
 0x7df   : > { %2745 = vmatprep.mubr.msk.bf16.mxu1 %vm2990_vm1, %v2989_v0 }
 0x7e0   : > { %v1615_v17 = vsel %vm902_vm4, %v1609_v14, 0 }
 0x7e1   : > { %2738 = vmatpush3.bf16.xpose.msra.mxu0 %v1615_v17 }
 0x7e2   : > { %2749 = vmatprep.subr.bf16.mxu0 %v2989_v0 }
 0x8a1   : > { %v1360_v19 = vpop.f32.mrb[24].mxu1 }
 0x8a2   : > { %v3362_v20 = vadd.f32 %v1406_v3, %v1360_v19  ;;  %v2705_v21 = vpop.f32.mrb[25].mxu1 }
 0x8a3   : > { %v1363_v22 = vpop.f32.mrb[26].mxu1 }
 0x8a4   : > { %v2706_v23 = vpop.f32.mrb[27].mxu1 }
 0x8a9   : > { %v1471_v25 = vpop.f32.mrb[28].mxu1 }
 0x8aa   : > { %v1472_v26 = vadd.f32 %v2477_v24, %v1471_v25  ;;  %v2719_v27 = vpop.f32.mrb[29].mxu1  ;;  %v2517_v25 = vld [vmem:[%s3564_s10 + $0x3] ss:$0 sm:$0xff] }
 0x8ab   : > { %v1474_v28 = vpop.f32.mrb[30].mxu1 }
 0x8ac   : > { %v1477_v29 = vmul.f32 0.35355338, %v1472_v26  ;;  %v2720_v30 = vpop.f32.mrb[31].mxu1  ;;  %v2508_v26 = vld [vmem:[%s3563_s9 + $0x3] ss:$0 sm:$0xff] }
 0x8ae   : > { %v1608_v31 = vpack.c.bf16 %v1477_v29, %v1477_v29 }
 0x8b0   : > { %2740 = vmatmul.mubr.msk.bf16.vlgmr.msra.gmra.mrb[28].mxu0 %vm902_vm4, %v1608_v31 }
 0x8b1   : > { %v1602_v33 = vpop.f32.mrb[32].mxu1  ;;  %2751 = vmatprep.mubr.msk.bf16.mxu0 %vm2990_vm1, %v2989_v0  ;;  %2750 = vmatpush3.bf16.msra.mxu0 %v1723_v53 }
 0x8b2   : > { %v1603_v34 = vadd.f32 %v2495_v32, %v1602_v33  ;;  %v2735_v35 = vpop.f32.mrb[33].mxu1  ;;  %2763 = vmatprep.subr.bf16.mxu0 %v2989_v0 }
 0x8b3   : > { %v1605_v36 = vpop.f32.mrb[34].mxu1 }
 0x8b4   : > { %v1610_v37 = vpack.c.bf16 %v1603_v34, %v1603_v34  ;;  %v2736_v38 = vpop.f32.mrb[35].mxu1 }
 0x8b6   : > { %v1674_v39 = vsel %vm967_vm5, %v1610_v37, 0 }
 0x8b7   : > { %2744 = vmatpush3.bf16.msra.mxu1 %v1674_v39 }
 0x8b8   : > { %2755 = vmatprep.subr.bf16.mxu1 %v2989_v0 }
 0x983   : > { %v1651_v40 = vpop.f32.mrb[28].mxu0 }
 0x984   : > { %v1657_v41 = vsel %vm3259_vm6, %v1651_v40, -1e+30  ;;  %v2741_v42 = vpop.f32.mrb[29].mxu0 }
 0x985   : > { %v1654_v43 = vpop.f32.mrb[30].mxu0  ;;  %v1658_v44 = vsel %vm902_vm4, %v1657_v41, -inf }
 0x986   : > { %1659 = vmax.xlane.f32.xlu0 %v1658_v44  ;;  %v2742_v45 = vpop.f32.mrb[31].mxu0 }
 0xa13   : > { %v1660_v46 = vpop.xlane.xlu0 %1659 }
 0xa14   : > { %v1661_v47 = vsub.f32 %v1657_v41, %v1660_v46 }
 0xa16   : > { %v1662_v48 = vmul.f32 1.442695, %v1661_v47  ;;  %v2532_v47 = vld [vmem:[%s3562_s8 + $0xc] sm:$0xf] }
 0xa17   : > { %v2077_v51 = vsel %vm967_vm5, %v2532_v47, 0 }
 0xa18   : > { %2898 = vpow2.f32 %v1662_v48 }
 0xa22   : > { %v2899_v49 = vpop.eup %2898 }
 0xa23   : > { %v1664_v50 = vsel %vm902_vm4, %v2899_v49, 0.0 }
 0xa24   : > { %1665 = vadd.xlane.f32.xlu1 %v1664_v50 }
 0xab1   : > { %v1666_v54 = vpop.xlane.xlu1 %1665 }
 0xab2   : > { %2900 = vrcp.f32 %v1666_v54 }
 0xabc   : > { %v2901_v55 = vpop.eup %2900 }
 0xabd   : > { %v1668_v56 = vmul.f32 %v2901_v55, %v2899_v49 }
 0xabf   : > { %v1669_v58 = vpack.c.bf16 %v1668_v56, %v1668_v56 }
 0xac1   : > { %2746 = vmatmul.mubr.msk.bf16.vlgmr.msra.gmra.mrb[36].mxu1 %vm902_vm4, %v1669_v58 }
 0xac2   : > { %2756 = vmatpush3.bf16.msra.mxu1 %v2878_v57  ;;  %2759 = vmatprep.mubr.msk.bf16.mxu1 %vm2990_vm1, %v2989_v0 }
 0xac3   : > { %2757 = vmatprep.subr.bf16.mxu1 %v2989_v0 }
 0xac6   : > { %2758 = vmatpush3.bf16.msra.mxu1 %v2879_v59 }
 0xac7   : > { %2771 = vmatprep.subr.bf16.mxu1 %v2989_v0 }
 0xac9   : > { %2760 = vmatmul.mubr.msk.bf16.vlgmr.msra.gmra.mrb[40].mxu1 %vm728_vm3, %v3199_v18 }
 0xaca   : > { %2772 = vmatpush3.bf16.msra.mxu1 %v2880_v60  ;;  %2775 = vmatprep.mubr.msk.bf16.mxu1 %vm2990_vm1, %v2989_v0 }
 0xacb   : > { %2773 = vmatprep.subr.bf16.mxu1 %v2989_v0 }
 0xace   : > { %2774 = vmatpush3.bf16.msra.mxu1 %v2881_v61 }
 0xacf   : > { %2785 = vmatprep.subr.bf16.mxu1 %v2989_v0 }
 0xad1   : > { %2776 = vmatmul.mubr.msk.bf16.vlgmr.msra.gmra.mrb[44].mxu1 %vm728_vm3, %v3199_v18 }
 0xad2   : > { %2787 = vmatprep.mubr.msk.bf16.mxu1 %vm2990_vm1, %v2989_v0 }
 0xb94   : > { %v1710_v62 = vpop.f32.mrb[36].mxu1 }
 0xb95   : > { %v1716_v1 = vpack.c.bf16 %v1710_v62, %v1710_v62  ;;  %v2747_v2 = vpop.f32.mrb[37].mxu1  ;;  %v2534_v62 = vld [vmem:[%s3566_s12] ss:$0 sm:$0xff] }
 0xb96   : > { %v1713_v3 = vpop.f32.mrb[38].mxu1 }
 0xb97   : > { %v2748_v4 = vpop.f32.mrb[39].mxu1  ;;  %2752 = vmatmul.mubr.msk.bf16.vlgmr.msra.gmra.mrb[32].mxu0 %vm902_vm4, %v1716_v1 }
 0xb98   : > { %2764 = vmatpush3.bf16.msra.mxu0 %v2882_v63  ;;  %2767 = vmatprep.mubr.msk.bf16.mxu0 %vm2990_vm1, %v2989_v0 }
 0xb99   : > { %2765 = vmatprep.subr.bf16.mxu0 %v2989_v0 }
 0xb9c   : > { %v1825_v6 = vpop.f32.mrb[40].mxu1  ;;  %2766 = vmatpush3.bf16.msra.mxu0 %v2883_v5 }
 0xb9d   : > { %v2761_v7 = vpop.f32.mrb[41].mxu1  ;;  %2779 = vmatprep.subr.bf16.mxu0 %v2989_v0  ;;  %v1826_v31 = vadd.f32 %v2508_v26, %v1825_v6  ;;  %v2537_v26 = vld [vmem:[%s3570_s16] ss:$0 sm:$0xff] }
 0xb9e   : > { %v1828_v8 = vpop.f32.mrb[42].mxu1 }
 0xb9f   : > { %v2762_v9 = vpop.f32.mrb[43].mxu1  ;;  %2768 = vmatmul.mubr.msk.bf16.vlgmr.msra.gmra.mrb[36].mxu0 %vm728_vm3, %v3199_v18  ;;  %v1831_v34 = vmul.f32 0.35355338, %v1826_v31 }
 0xba0   : > { %2781 = vmatprep.mubr.msk.bf16.mxu0 %vm2990_vm1, %v2989_v0  ;;  %v2884_v9 = vld [vmem:[%s3569_s15] sm:$0xff]  }
 0xba1   : > { %v1962_v35 = vpack.c.bf16 %v1831_v34, %v1831_v34 }
 0xba4   : > { %v1956_v11 = vpop.f32.mrb[44].mxu1 }
 0xba5   : > { %v1957_v12 = vadd.f32 %v2526_v10, %v1956_v11  ;;  %v2777_v13 = vpop.f32.mrb[45].mxu1  ;;  %v2886_v10 = vld [vmem:[%s3571_s17] sm:$0xff]   ;;  %v2887_v11 = vld [vmem:[%s3571_s17 + $0x8] sm:$0xff]  }
 0xba6   : > { %v1959_v14 = vpop.f32.mrb[46].mxu1 }
 0xba7   : > { %v1964_v16 = vpack.c.bf16 %v1957_v12, %v1957_v12  ;;  %v2778_v17 = vpop.f32.mrb[47].mxu1 }
 0xba8   : > { %v2535_v17 = vld [vmem:[%s3567_s13] ss:$0 sm:$0xff] }
 0xba9   : > { %v2028_v19 = vsel %vm967_vm5, %v1964_v16, 0 }
 0xbaa   : > { %2786 = vmatpush3.bf16.msra.mxu1 %v2028_v19 }
 0xbab   : > { %2797 = vmatprep.subr.bf16.mxu1 %v2989_v0 }
 0xc6a   : > { %v1759_v21 = vpop.f32.mrb[32].mxu0 }
 0xc6b   : > { %v1765_v18 = vadd.f32 %v1759_v21, %v3362_v20  ;;  %v2753_v22 = vpop.f32.mrb[33].mxu0  ;;  %v2536_v21 = vld [vmem:[%s3606_s26] ss:$0 sm:$0xff]  ;;  %s2345_s26 = scalar_lea.sflag [#allocation5], %s625_s2 }
 0xc6c   : > { %v1762_v23 = vpop.f32.mrb[34].mxu0 }
 0xc6d   : > { %v2754_v24 = vpop.f32.mrb[35].mxu0 }
 0xc6e   : > { %v2888_v24 = vld [vmem:[%s3571_s17 + $0x10] sm:$0xff]  }
 0xc72   : > { %v1891_v27 = vpop.f32.mrb[36].mxu0 }
 0xc73   : > { %v1892_v28 = vadd.f32 %v2517_v25, %v1891_v27  ;;  %v2769_v29 = vpop.f32.mrb[37].mxu0  ;;  %v2889_v25 = vld [vmem:[%s3571_s17 + $0x18] sm:$0xff]  }
 0xc74   : > { %v1894_v30 = vpop.f32.mrb[38].mxu0 }
 0xc75   : > { %v1963_v32 = vpack.c.bf16 %v1892_v28, %v1892_v28  ;;  %v2770_v33 = vpop.f32.mrb[39].mxu0 }
 0xc77   : > { %v1969_v20 = vsel %vm902_vm4, %v1963_v32, 0 }
 0xc78   : > { %2780 = vmatpush3.bf16.xpose.msra.mxu0 %v1969_v20 }
 0xc79   : > { %2791 = vmatprep.subr.bf16.mxu0 %v2989_v0 }
 0xc7f   : > { %2782 = vmatmul.mubr.msk.bf16.vlgmr.msra.gmra.mrb[40].mxu0 %vm902_vm4, %v1962_v35 }
 0xc80   : > { %2793 = vmatprep.mubr.msk.bf16.mxu0 %vm2990_vm1, %v2989_v0  ;;  %2792 = vmatpush3.bf16.msra.mxu0 %v2077_v51 }
 0xc81   : > { %2805 = vmatprep.subr.bf16.mxu0 %v2989_v0 }
 0xd52   : > { %v2005_v36 = vpop.f32.mrb[40].mxu0 }
 0xd53   : > { %v2011_v37 = vsel %vm3259_vm6, %v2005_v36, -1e+30  ;;  %v2783_v38 = vpop.f32.mrb[41].mxu0 }
 0xd54   : > { %v2008_v39 = vpop.f32.mrb[42].mxu0  ;;  %v2012_v40 = vsel %vm902_vm4, %v2011_v37, -inf }
 0xd55   : > { %2013 = vmax.xlane.f32.xlu0 %v2012_v40  ;;  %v2784_v41 = vpop.f32.mrb[43].mxu0 }
 0xde2   : > { %v2014_v42 = vpop.xlane.xlu0 %2013 }
 0xde3   : > { %v2015_v43 = vsub.f32 %v2011_v37, %v2014_v42 }
 0xde5   : > { %v2016_v44 = vmul.f32 1.442695, %v2015_v43 }
 0xde7   : > { %2902 = vpow2.f32 %v2016_v44 }
 0xdf1   : > { %v2903_v45 = vpop.eup %2902 }
 0xdf2   : > { %v2018_v46 = vsel %vm902_vm4, %v2903_v45, 0.0 }
 0xdf3   : > { %2019 = vadd.xlane.f32.xlu1 %v2018_v46 }
 0xe80   : > { %v2020_v48 = vpop.xlane.xlu1 %2019 }
 0xe81   : > { %2904 = vrcp.f32 %v2020_v48  ;;  %v2547_v48 = vld [vmem:[%s3573_s19] ss:$0 sm:$0xff] }
 0xe8b   : > { %v2905_v49 = vpop.eup %2904 }
 0xe8c   : > { %v2022_v50 = vmul.f32 %v2905_v49, %v2903_v45 }
 0xe8e   : > { %v2023_v52 = vpack.c.bf16 %v2022_v50, %v2022_v50  ;;  %v2548_v50 = vld [vmem:[%s3574_s20] ss:$0 sm:$0xff] }
 0xe90   : > { %2788 = vmatmul.mubr.msk.bf16.vlgmr.msra.gmra.mrb[48].mxu1 %vm902_vm4, %v2023_v52 }
 0xe91   : > { %2801 = vmatprep.mubr.msk.bf16.mxu1 %vm2990_vm1, %v2989_v0  ;;  %2798 = vmatpush3.bf16.msra.mxu1 %v2884_v9 }
 0xe92   : > { %2799 = vmatprep.subr.bf16.mxu1 %v2989_v0 }
 0xf63   : > { %v2064_v53 = vpop.f32.mrb[48].mxu1 }
 0xf64   : > { %v2070_v54 = vpack.c.bf16 %v2064_v53, %v2064_v53  ;;  %v2789_v55 = vpop.f32.mrb[49].mxu1 }
 0xf65   : > { %v2067_v56 = vpop.f32.mrb[50].mxu1 }
 0xf66   : > { %v2790_v57 = vpop.f32.mrb[51].mxu1  ;;  %2794 = vmatmul.mubr.msk.bf16.vlgmr.msra.gmra.mrb[44].mxu0 %vm902_vm4, %v2070_v54 }
 0xf67   : > { %2813 = vmatprep.mubr.msk.bf16.mxu0 %vm2990_vm1, %v2989_v0  ;;  %2806 = vmatpush3.bf16.msra.mxu0 %v2886_v10 }
 0xf68   : > { %2807 = vmatprep.subr.bf16.mxu0 %v2989_v0 }
 0xf6b   : > { %2808 = vmatpush3.bf16.msra.mxu0 %v2887_v11 }
 0xf6c   : > { %2809 = vmatprep.subr.bf16.mxu0 %v2989_v0 }
 0xf6f   : > { %2810 = vmatpush3.bf16.msra.mxu0 %v2888_v24 }
 0xf70   : > { %2811 = vmatprep.subr.bf16.mxu0 %v2989_v0  ;;  %v2541_v0 = vld [vmem:[%s3572_s18] ss:$0 sm:$0xff] }
 0xf73   : > { %2812 = vmatpush3.bf16.msra.mxu0 %v2889_v25 }
0x1039   : > { %v2113_v58 = vpop.f32.mrb[44].mxu0 }
0x103a   : > { %v2119_v59 = vadd.f32 %v2113_v58, %v1765_v18  ;;  %v2795_v60 = vpop.f32.mrb[45].mxu0 }
0x103b   : > { %v2116_v61 = vpop.f32.mrb[46].mxu0 }
0x103c   : > { %v2120_v63 = vadd.f32 %v2119_v59, %v3192_v15  ;;  %v2796_v1 = vpop.f32.mrb[47].mxu0  ;;  %v2885_v15 = vld [vmem:[%s3569_s15 + $0x8] sm:$0xff]  }
0x103d   : > { %2800 = vmatpush3.bf16.msra.mxu1 %v2885_v15 }
0x103e   : > { %v2128_v2 = vadd.f32 %v2534_v62, %v2120_v63 }
0x1040   : > { %v2129_v3 = vsel %vm728_vm3, %v2128_v2, 0.0 }
0x1041   : > { %2130 = vadd.xlane.f32.xlu0 %v2129_v3 }
0x10ce   : > { %v2131_v4 = vpop.xlane.xlu0 %2130 }
0x10cf   : > { %v2133_v5 = vmul.f32 0.03125, %v2131_v4 }
0x10d1   : > { %v2134_v6 = vsub.f32 %v2128_v2, %v2133_v5 }
0x10d3   : > { %v2135_v7 = vmul.f32 %v2134_v6, %v2134_v6 }
0x10d5   : > { %v2136_v8 = vsel %vm728_vm3, %v2135_v7, 0.0 }
0x10d6   : > { %2137 = vadd.xlane.f32.xlu1 %v2136_v8 }
0x1163   : > { %v2138_v12 = vpop.xlane.xlu1 %2137 }
0x1164   : > { %v2139_v13 = vmul.f32 0.03125, %v2138_v12 }
0x1166   : > { %v2140_v14 = vadd.f32 1e-05, %v2139_v13 }
0x1168   : > { %2906 = vrsqrt.f32 %v2140_v14 }
0x1172   : > { %v2907_v16 = vpop.eup %2906 }
0x1173   : > { %v2142_v19 = vmul.f32 %v2907_v16, %v2134_v6 }
0x1175   : > { %v2150_v18 = vmul.f32 %v2535_v17, %v2142_v19 }
0x1177   : > { %v2158_v22 = vadd.f32 %v2536_v21, %v2150_v18 }
0x1179   : > { %v2159_v23 = vpack.c.bf16 %v2158_v22, %v2158_v22 }
0x117b   : > { %2802 = vmatmul.mubr.msk.bf16.vlgmr.msra.gmra.mrb[52].mxu1 %vm728_vm3, %v2159_v23 }
0x124e   : > { %v2220_v27 = vpop.f32.mrb[52].mxu1 }
0x124f   : > { %v2221_v28 = vadd.f32 %v2537_v26, %v2220_v27  ;;  %v2803_v29 = vpop.f32.mrb[53].mxu1 }
0x1250   : > { %v2223_v30 = vpop.f32.mrb[54].mxu1 }
0x1251   : > { %v2226_v31 = vmax.f32 %v2221_v28, 0.0  ;;  %v2804_v32 = vpop.f32.mrb[55].mxu1 }
0x1253   : > { %v2227_v33 = vpack.c.bf16 %v2226_v31, %v2226_v31 }
0x1255   : > { %2814 = vmatmul.mubr.msk.bf16.vlgmr.msra.gmra.mrb[48].mxu0 %vm2267_vm7, %v2227_v33 }
0x1328   : > { %v2305_v20 = vpop.f32.mrb[48].mxu0 }
0x1329   : > { %v2306_v34 = vadd.f32 %v2541_v0, %v2305_v20  ;;  %v2815_v35 = vpop.f32.mrb[49].mxu0 }
0x132a   : > { %v2308_v36 = vpop.f32.mrb[50].mxu0 }
0x132b   : > { %v2816_v37 = vpop.f32.mrb[51].mxu0  ;;  %v2311_v38 = vadd.f32 %v2306_v34, %v2158_v22 }
0x132d   : > { %v2312_v39 = vsel %vm728_vm3, %v2311_v38, 0.0 }
0x132e   : > { %2313 = vadd.xlane.f32.xlu0 %v2312_v39 }
0x13bb   : > { %v2314_v40 = vpop.xlane.xlu0 %2313 }
0x13bc   : > { %v2315_v41 = vmul.f32 0.03125, %v2314_v40 }
0x13be   : > { %v2316_v42 = vsub.f32 %v2311_v38, %v2315_v41 }
0x13c0   : > { %v2317_v43 = vmul.f32 %v2316_v42, %v2316_v42 }
0x13c2   : > { %v2318_v44 = vsel %vm728_vm3, %v2317_v43, 0.0 }
0x13c3   : > { %2319 = vadd.xlane.f32.xlu1 %v2318_v44 }
0x1450   : > { %v2320_v45 = vpop.xlane.xlu1 %2319 }
0x1451   : > { %v2321_v46 = vmul.f32 0.03125, %v2320_v45 }
0x1453   : > { %v2322_v47 = vadd.f32 1e-05, %v2321_v46 }
0x1455   : > { %2908 = vrsqrt.f32 %v2322_v47 }
0x145f   : > { %v2909_v51 = vpop.eup %2908 }
0x1460   : > { %v2324_v49 = vmul.f32 %v2909_v51, %v2316_v42 }
0x1462   : > { %v2332_v52 = vmul.f32 %v2547_v48, %v2324_v49 }
0x1464   : > { %v2340_v53 = vadd.f32 %v2548_v50, %v2332_v52 }
0x1466   : > { %v2341_v54 = vpack.c.bf16 %v2340_v53, %v2340_v53 }
0x1468   : > { %2343 = vst.msk [vmem:[%s627_s23] sm:$0xf] %vm2342_vm8, %v2341_v54 }
0x1469   : > { %2935 = shalt.err (!%p2932_p8)
}
0x146a   : > { %s2936_s2 = scalar_lea.hbm %s3512_s5, 64  ;;  %s2940_s23 = scalar_lea.hbm %s3575_s21, 128 }
0x146b   : > { %p2937_p9 = scmp.ne.s32.totalorder %s3512_s5, %s2936_s2  ;;  %p2941_p0 = scmp.lt.u32.totalorder %s3512_s5, %s3575_s21 }
0x146c   : > { %p2942_p1 = scmp.lt.u32.totalorder %s2940_s23, %s2936_s2  ;;  %p2944_p3 = scmp.lt.u32.totalorder %s2936_s2, %s3512_s5 }
0x146d   : > { %p2938_p12 = pnand %p2937_p9, %p3143_p10 }
0x146e   : > { %p2943_p2 = por %p2942_p1, %p2941_p0 }
0x146f   : > { %p2939_p13 = pneg %p2938_p12 }
0x1470   : > { %p2945_p4 = por %p2944_p3, %p2943_p2 }
0x1472   : > { %p2946_p5 = pnand %p2945_p4, %p2939_p13 }
0x1474   : > { %2949 = shalt.err (!%p2946_p5)
}
0x1475   : > { %2817 = dma.vmem_to_hbm [thread:$0]  (%p3143_p10), %s3514_s28, 64, %s3512_s5, %s2345_s26  }
0x1476 PF: > { %s3607_s27 = sld [smem:[#allocation8_spill]]  ;;  %p2823_p6 = scmp.ge.s32.totalorder %s2986_s4, 2 }
0x1478   : > { %p2820_p7 = pnand %p2823_p6, %p3147_p11 }
0x147c   : > { %s2370_s25 = sand.u32 1, %s3607_s27  }
0x147d   : > { %s2371_s3 = scalar_lea.sflag [#allocation5], %s2370_s25 }
0x147e   : > { %2969 = dma.done.wait (!%p2820_p7), %s2371_s3, 64  }
0x147f   : > { %2971 = vsyncadd (!%p2820_p7), %s2371_s3, 4294967232  ;;  %s3609_s4 = sld [smem:[#allocation10_spill]]  ;;  %s3610_s2 = sld [smem:[#allocation9_spill]] }
0x1480   : > { %s3611_s0 = sld [smem:[#allocation11_spill]]  ;;  %s3612_s28 = smov %s2978_s29 }
0x1485   : > { %p37_p8 = scmp.ge.s32.totalorder %s3609_s4, 4   ;;  %s3613_s29 = smov %s3610_s2 }
0x1487   :  { %39 = sbr.rel (!%p37_p8) target bundleno = 25 (0x19), region = 156 }
0x148e   :  { %2376 = vsyncpa [#allocation5], 1 }
0x148f   :  { %2378 = vsyncpa [#allocation5 + $0x1], 1 }

</bundles_post_ra>
